<compile_context>
chip_gen: v7x
topology: tpu7x:2x2x1
jax: 0.10.0
libtpu: 0.0.40
codegen_flags: <defaults>
</compile_context>

<pallas_src>
import numpy as np
import jax
import jax.numpy as jnp
from jax.experimental import pallas as pl
from jax.experimental.pallas import tpu as pltpu


# ----------------------------------------------------------------------------- kernel
def _resonance_kernel(routed_ref, defs_ref, noise_ref, w_up_ref, w_def_ref,
                      toep_ref, gains_ref, summed_ref):
    # Block layouts (one grid step == TB batch-events):
    #   routed_ref : (1, NR*TB, F)    rows ordered [resonance-major, local batch-event]
    #   defs_ref   : (1, EXP*TB, DF)  rows ordered [expressivity-major, local batch-event]
    #   noise_ref  : (1, NR*TB, N)
    #   w_up_ref   : (F, N)  w_def_ref: (DF, N)   linear-interp (upsample) matrices
    #   toep_ref   : (NR, N, EXP*N)   bf16 causal-conv Toeplitz forms (exp. concat on cols)
    #   gains_ref  : (NR, 1)          |gains|, precomputed on the host
    #   summed_ref : (TB, N)          lane-dense output block
    TB, N = summed_ref.shape
    NR = routed_ref.shape[1] // TB
    EXP = defs_ref.shape[1] // TB

    # Linear upsample (frames -> n_samples) of every (resonance, batch-event) row as a
    # single MXU matmul, then the impulse-noise gate.
    routed = routed_ref[0]                                                     # (NR*TB, F)
    up = jnp.dot(routed, w_up_ref[...], preferred_element_type=jnp.float32)    # (NR*TB, N)
    up = up * noise_ref[0]

    # Deformation mixing weights: softmax over expressivity (row groups of TB; the base
    # one-hot on expressivity 0 is pre-added in the wrapper), then upsample to n_samples.
    # EXP is small and static, so plain Python loops over aligned 8-sublane slices.
    defs = defs_ref[0]                                                         # (EXP*TB, DF)
    m = defs[0:TB, :]
    for xi in range(1, EXP):
        m = jnp.maximum(m, defs[xi * TB:(xi + 1) * TB, :])
    e = [jnp.exp(defs[xi * TB:(xi + 1) * TB, :] - m) for xi in range(EXP)]
    denom = e[0]
    for xi in range(1, EXP):
        denom = denom + e[xi]
    inv = pl.reciprocal(denom, approx=True)                  # EUP slot; frees the VALU
    d_up = [jnp.dot(e[xi] * inv, w_def_ref[...],
                    preferred_element_type=jnp.float32) for xi in range(EXP)]  # EXP x (TB, N)

    gains = gains_ref[...]                                                     # (NR, 1)

    # Causal convolution with each resonance (one bf16 MXU matmul per resonance, f32
    # accumulation), deformation-weighted expressivity sum, per-resonance gain + tanh,
    # and the resonance reduction accumulated directly (no staging scratch).
    acc = jnp.zeros((TB, N), jnp.float32)
    for r in range(NR):
        lhs = up[r * TB:(r + 1) * TB, :].astype(jnp.bfloat16)                  # (TB, N)
        conv = jnp.dot(lhs, toep_ref[r], preferred_element_type=jnp.float32)   # (TB, EXP*N)
        xr = d_up[0] * conv[:, 0:N]
        for xi in range(1, EXP):
            xr = xr + d_up[xi] * conv[:, xi * N:(xi + 1) * N]
        acc = acc + jnp.tanh(xr * gains[r:r + 1, 0:1])
    summed_ref[...] = acc


# --------------------------------------------------------------------------- wrapper
def resonance_layer_forward(control_signal, deformations, noise,
                            router, w_up, w_def, toep, gains, *, tb=8):
    """Forward pass of ResonanceLayer / execute_layer.

    control_signal: (B, E, C, F)     deformations: (B, E, EXP, DF)
    noise:          (B, E, NR, N)    router:       (C, NR)
    w_up: (F, N)   w_def: (DF, N)    toep: (NR, EXP, N, N)   gains: (NR, 1)
    Returns (summed (B, E, 1, N), before_upsample (B, E, NR, F)).
    """
    B, E, C, F = control_signal.shape
    _, _, EXP, DF = deformations.shape
    NR = noise.shape[2]
    N = w_up.shape[1]
    BE = B * E

    cs_flat = control_signal.reshape(BE, C, F).astype(jnp.float32)

    # Control-plane -> resonance routing is tiny (NR*C*F flops) and its natural output
    # layout is lane-sparse (last dim F < 128), so it stays in plain XLA and doubles as
    # the `before_upsample` output.  The kernel only writes the lane-dense summed block.
    routed = jnp.einsum('xcf,cr->xrf', cs_flat, router.astype(jnp.float32))    # (BE, NR, F)
    before_upsample = routed.reshape(B, E, NR, F)

    # Batch-event chunking: TB batch-events per grid step (multiple of 8 sublanes).
    # For v7x megacore pick TB so that the grid length G is >= 2.
    TB = max(8, ((tb + 7) // 8) * 8)
    BE_pad = ((BE + TB - 1) // TB) * TB
    G = BE_pad // TB
    pad = BE_pad - BE

    def group_rows(x):
        # (BE, K, L) -> (G, K*TB, L); block-local rows ordered [k-major, batch-event].
        K, L = x.shape[1], x.shape[2]
        if pad:
            x = jnp.pad(x, ((0, pad), (0, 0), (0, 0)))
        return x.reshape(G, TB, K, L).transpose(0, 2, 1, 3).reshape(G, K * TB, L)

    defs_flat = deformations.reshape(BE, EXP, DF).astype(jnp.float32)
    defs_flat = defs_flat.at[:, 0, :].add(1.0)       # base one-hot, hoisted out of kernel

    routed_g = group_rows(routed)                                          # (G, NR*TB, F)
    defs_g = group_rows(defs_flat)                                         # (G, EXP*TB, DF)
    noise_g = group_rows(noise.reshape(BE, NR, N).astype(jnp.float32))     # (G, NR*TB, N)

    # Resonance Toeplitz forms: expressivity variants concatenated along columns so each
    # resonance is a single (TB, N) @ (N, EXP*N) matmul; bf16 weights, f32 accumulation.
    toep_cat = toep.transpose(0, 2, 1, 3).reshape(NR, N, EXP * N).astype(jnp.bfloat16)
    gains_abs = jnp.abs(gains).reshape(NR, 1).astype(jnp.float32)          # hoisted |gains|

    w_up32 = w_up.astype(jnp.float32)
    w_def32 = w_def.astype(jnp.float32)

    def build(single_buffer_invariants):
        # Grid-invariant operands (constant index_map) never need re-DMA; request a
        # single VMEM buffer for them when this jax version supports pipeline_mode.
        inv = {'pipeline_mode': pl.Buffered(1)} if single_buffer_invariants else {}
        grid_spec = pltpu.PrefetchScalarGridSpec(
            num_scalar_prefetch=0,
            grid=(G,),
            in_specs=[
                pl.BlockSpec((1, NR * TB, F), lambda i: (i, 0, 0)),     # routed rows
                pl.BlockSpec((1, EXP * TB, DF), lambda i: (i, 0, 0)),   # deformation rows
                pl.BlockSpec((1, NR * TB, N), lambda i: (i, 0, 0)),     # noise rows
                pl.BlockSpec((F, N), lambda i: (0, 0), **inv),          # frame interp
                pl.BlockSpec((DF, N), lambda i: (0, 0), **inv),         # deform interp
                pl.BlockSpec((NR, N, EXP * N), lambda i: (0, 0, 0), **inv),  # bf16 Toeplitz
                pl.BlockSpec((NR, 1), lambda i: (0, 0), **inv),         # |gains|
            ],
            out_specs=pl.BlockSpec((TB, N), lambda i: (i, 0)),          # lane-dense output
        )
        return pl.pallas_call(
            _resonance_kernel,
            out_shape=jax.ShapeDtypeStruct((BE_pad, N), jnp.float32),
            grid_spec=grid_spec,
            compiler_params=pltpu.CompilerParams(
                dimension_semantics=("parallel",),
                # Explicit budget with headroom for v7x's 64 MiB/TC VMEM (plenty on
                # v5e/v6e's 128 MiB).
                vmem_limit_bytes=48 * 1024 * 1024),
        )

    args = (routed_g, defs_g, noise_g, w_up32, w_def32, toep_cat, gains_abs)
    try:
        summed = build(True)(*args)
    except Exception:
        # pipeline_mode=pl.Buffered(1) not supported by this jax/Mosaic version; fall
        # back to default double-buffering (identical results, 2x VMEM residency for
        # the grid-invariant operands).
        summed = build(False)(*args)

    return summed[:BE].reshape(B, E, 1, N), before_upsample


# ------------------------------------------------------------------------ JAX "glue"
def linear_interp_matrix(src, dst):
    # Matches torch.nn.functional.interpolate(mode='linear', align_corners=False)
    pos = (np.arange(dst) + 0.5) * (src / dst) - 0.5
    pos = np.clip(pos, 0.0, src - 1.0)
    lo = np.floor(pos).astype(np.int64)
    hi = np.minimum(lo + 1, src - 1)
    w_hi = (pos - lo).astype(np.float32)
    w_lo = 1.0 - w_hi
    W = np.zeros((src, dst), dtype=np.float32)
    W[lo, np.arange(dst)] += w_lo
    W[hi, np.arange(dst)] += w_hi
    return jnp.asarray(W)


def unit_norm(x, axis=-1, eps=1e-8):
    return x / (jnp.linalg.norm(x, axis=axis, keepdims=True) + eps)


def freq_domain_transfer_function_to_resonance(window_size, coeffs, n_frames,
                                               start_phase, start_mags,
                                               log_space_scan=True):
    # TODO(synk): this helper is undefined in the provided reference; reimplemented from
    # its signature (per-frame log-space decay scan, phase-accumulated irfft frames,
    # Hann-windowed overlap-add) -- exact constants of the original may differ.
    n_coeffs = window_size // 2 + 1
    hop = window_size // 2
    lead = coeffs.shape[:-1]
    mags = jnp.broadcast_to(coeffs[..., None, :], lead + (n_frames, n_coeffs))
    if log_space_scan:
        mags = jnp.exp(jnp.cumsum(jnp.log(mags + 1e-12), axis=-2))
    else:
        mags = jnp.cumprod(mags, axis=-2)
    mags = mags * start_mags[..., None, :]
    omega = jnp.linspace(0.0, np.pi, n_coeffs)                      # per-frame phase advance
    frame_idx = jnp.arange(1, n_frames + 1, dtype=jnp.float32)[:, None]
    phases = start_phase[..., None, :] + frame_idx * omega[None, :]
    spec = mags.astype(jnp.complex64) * jnp.exp(1j * phases)
    frames_td = jnp.fft.irfft(spec, n=window_size, axis=-1)         # (..., n_frames, window)
    frames_td = frames_td * jnp.hanning(window_size).astype(jnp.float32)
    out_len = (n_frames - 1) * hop + window_size
    out = jnp.zeros(lead + (out_len,), dtype=jnp.float32)
    for f in range(n_frames):
        out = out.at[..., f * hop:f * hop + window_size].add(frames_td[..., f, :])
    return out[..., :n_frames * hop]


def materialize_resonances(amp, phase, decay, n_samples, window_size, base_resonance=0.5):
    # FFTResonanceBlock._materialize_fft_resonances
    res_span = 1.0 - base_resonance
    res_factor = 0.9
    amp_p = jnp.transpose(amp, (0, 2, 1))      # (NR, EXP, n_coeffs)
    phase_p = jnp.transpose(phase, (0, 2, 1))
    decay_p = jnp.transpose(decay, (0, 2, 1))
    n_frames = n_samples // (window_size // 2)
    res = freq_domain_transfer_function_to_resonance(
        window_size,
        base_resonance + jax.nn.sigmoid(decay_p) * res_span * res_factor,
        n_frames,
        start_phase=jnp.tanh(phase_p) * np.pi,
        start_mags=jnp.abs(amp_p),
        log_space_scan=True)
    return res                                 # (NR, EXP, n_samples)


def build_toeplitz(res):
    # res: (NR, EXP, N) unit-normed resonances.
    # fft_convolve (zero-padded rfft multiply) == causal linear convolution, so
    # conv[..., t] = sum_tau routed[tau] * res[t - tau]  ==  routed @ Toeplitz(res)
    # TODO(synk): for audio-scale n_samples replace this dense O(N^2) Toeplitz with a
    # banded / overlap-save blocked convolution so the weights stay VMEM-resident.
    N = res.shape[-1]
    tau = jnp.arange(N)[:, None]
    t = jnp.arange(N)[None, :]
    lag = t - tau
    g = res[:, :, jnp.clip(lag, 0, N - 1)]     # (NR, EXP, N, N)
    return jnp.where(lag >= 0, g, 0.0).astype(jnp.float32)


def init_params(key, window_size, C, NR, EXP):
    n_coeffs = window_size // 2 + 1
    ks = jax.random.split(key, 5)

    def init_resonance(k):
        k1, k2 = jax.random.split(k)
        res = jax.random.uniform(k1, (NR, n_coeffs, 1), minval=0.01, maxval=1.0)
        deform = jax.random.uniform(k2, (1, n_coeffs, EXP), minval=-0.02, maxval=0.02)
        return res + deform

    router = jax.random.uniform(ks[0], (C, NR), minval=-1.0, maxval=1.0)
    amp = init_resonance(ks[1])
    phase = init_resonance(ks[2])
    decay = init_resonance(ks[3])
    gains = jax.random.uniform(ks[4], (NR, 1), minval=0.01, maxval=1.1)
    return router, amp, phase, decay, gains


# ------------------------------------------------------------------------------ main
if __name__ == "__main__":
    batch, n_events = 2, 2
    control_plane_dim = 4
    n_resonances = 4
    expressivity = 2
    frames = 8
    def_frames = 8
    n_samples = 128
    resonance_window_size = 32
    base_resonance = 0.5

    key = jax.random.PRNGKey(0)
    k_param, k_cs, k_def, k_noise = jax.random.split(key, 4)

    router, amp, phase, decay, gains = init_params(
        k_param, resonance_window_size, control_plane_dim, n_resonances, expressivity)

    control_signal = jax.random.normal(
        k_cs, (batch, n_events, control_plane_dim, frames), dtype=jnp.float32)
    deformations = 0.1 * jax.random.normal(
        k_def, (batch, n_events, expressivity, def_frames), dtype=jnp.float32)
    # equivalent of `torch.zeros_like(routed).uniform_(-1, 1)` (same distribution,
    # different RNG stream), applied to the upsampled routed signal inside the kernel
    noise = jax.random.uniform(
        k_noise, (batch, n_events, n_resonances, n_samples),
        minval=-1.0, maxval=1.0, dtype=jnp.float32)

    res = materialize_resonances(amp, phase, decay, n_samples,
                                 resonance_window_size, base_resonance)
    res = unit_norm(res, axis=-1)
    toep = build_toeplitz(res)                 # (NR, EXP, N, N)

    w_up = linear_interp_matrix(frames, n_samples)
    w_def = linear_interp_matrix(def_frames, n_samples)

    summed, before_upsample = resonance_layer_forward(
        control_signal, deformations, noise, router, w_up, w_def, toep, gains)

    jax.block_until_ready((summed, before_upsample))
    assert summed.shape == (batch, n_events, 1, n_samples)
    assert before_upsample.shape == (batch, n_events, n_resonances, frames)
    assert bool(jnp.all(jnp.isfinite(summed))) and bool(jnp.all(jnp.isfinite(before_upsample)))
    print("KERNEL_OK")
</pallas_src>

<mosaic_0001>
module attributes {stable_mosaic.version = 11 : i64} {
  func.func @_resonance_kernel(%arg0: i32, %arg1: memref<1x32x8xf32, #tpu.memory_space<vmem>>, %arg2: memref<1x16x8xf32, #tpu.memory_space<vmem>>, %arg3: memref<1x32x128xf32, #tpu.memory_space<vmem>>, %arg4: memref<8x128xf32, #tpu.memory_space<vmem>>, %arg5: memref<8x128xf32, #tpu.memory_space<vmem>>, %arg6: memref<4x128x256xbf16, #tpu.memory_space<vmem>>, %arg7: memref<4x1xf32, #tpu.memory_space<vmem>>, %arg8: memref<8x128xf32, #tpu.memory_space<vmem>>) attributes {dimension_semantics = [#tpu.dimension_semantics<parallel>], iteration_bounds = array<i64: 1>, scalar_prefetch = 0 : i64, scratch_operands = 0 : i64, tpu.core_type = #tpu.core_type<tc>, window_params = [{transform_indices = @transform_0, window_bounds = array<i64: 1, 32, 8>}, {transform_indices = @transform_1, window_bounds = array<i64: 1, 16, 8>}, {transform_indices = @transform_2, window_bounds = array<i64: 1, 32, 128>}, {pipeline_mode = #tpu.pipeline_mode<synchronous>, transform_indices = @transform_3, window_bounds = array<i64: 8, 128>}, {pipeline_mode = #tpu.pipeline_mode<synchronous>, transform_indices = @transform_4, window_bounds = array<i64: 8, 128>}, {pipeline_mode = #tpu.pipeline_mode<synchronous>, transform_indices = @transform_5, window_bounds = array<i64: 4, 128, 256>}, {pipeline_mode = #tpu.pipeline_mode<synchronous>, transform_indices = @transform_6, window_bounds = array<i64: 4, 1>}, {transform_indices = @transform_7, window_bounds = array<i64: 8, 128>}]} {
    %c0 = arith.constant 0 : index
    %c0_0 = arith.constant 0 : index
    %c0_1 = arith.constant 0 : index
    %0 = vector.load %arg1[%c0, %c0_0, %c0_1] : memref<1x32x8xf32, #tpu.memory_space<vmem>>, vector<1x32x8xf32>
    %1 = vector.shape_cast %0 : vector<1x32x8xf32> to vector<32x8xf32>
    %c0_2 = arith.constant 0 : index
    %c0_3 = arith.constant 0 : index
    %2 = vector.load %arg4[%c0_2, %c0_3] : memref<8x128xf32, #tpu.memory_space<vmem>>, vector<8x128xf32>
    %cst = arith.constant dense<0.000000e+00> : vector<32x128xf32>
    %3 = tpu.matmul %1, %2, %cst {dimension_numbers = #tpu.dot_dimension_numbers<[1], [0], [0], [1], [0, 0, 1, 1], [], []>} : vector<32x8xf32>, vector<8x128xf32>, vector<32x128xf32> -> vector<32x128xf32>
    %c0_4 = arith.constant 0 : index
    %c0_5 = arith.constant 0 : index
    %c0_6 = arith.constant 0 : index
    %4 = vector.load %arg3[%c0_4, %c0_5, %c0_6] : memref<1x32x128xf32, #tpu.memory_space<vmem>>, vector<1x32x128xf32>
    %5 = vector.shape_cast %4 : vector<1x32x128xf32> to vector<32x128xf32>
    %6 = arith.mulf %3, %5 : vector<32x128xf32>
    %c0_7 = arith.constant 0 : index
    %c0_8 = arith.constant 0 : index
    %c0_9 = arith.constant 0 : index
    %7 = vector.load %arg2[%c0_7, %c0_8, %c0_9] : memref<1x16x8xf32, #tpu.memory_space<vmem>>, vector<1x16x8xf32>
    %8 = vector.shape_cast %7 : vector<1x16x8xf32> to vector<16x8xf32>
    %9 = vector.extract_strided_slice %8 {offsets = [0, 0], sizes = [8, 8], strides = [1, 1]} : vector<16x8xf32> to vector<8x8xf32>
    %10 = vector.extract_strided_slice %8 {offsets = [8, 0], sizes = [8, 8], strides = [1, 1]} : vector<16x8xf32> to vector<8x8xf32>
    %11 = arith.maximumf %9, %10 : vector<8x8xf32>
    %12 = vector.extract_strided_slice %8 {offsets = [0, 0], sizes = [8, 8], strides = [1, 1]} : vector<16x8xf32> to vector<8x8xf32>
    %13 = arith.subf %12, %11 : vector<8x8xf32>
    %14 = math.exp %13 : vector<8x8xf32>
    %15 = vector.extract_strided_slice %8 {offsets = [8, 0], sizes = [8, 8], strides = [1, 1]} : vector<16x8xf32> to vector<8x8xf32>
    %16 = arith.subf %15, %11 : vector<8x8xf32>
    %17 = math.exp %16 : vector<8x8xf32>
    %18 = arith.addf %14, %17 : vector<8x8xf32>
    %19 = tpu.reciprocal %18 {approx = true} : vector<8x8xf32> -> vector<8x8xf32>
    %20 = arith.mulf %14, %19 : vector<8x8xf32>
    %c0_10 = arith.constant 0 : index
    %c0_11 = arith.constant 0 : index
    %21 = vector.load %arg5[%c0_10, %c0_11] : memref<8x128xf32, #tpu.memory_space<vmem>>, vector<8x128xf32>
    %cst_12 = arith.constant dense<0.000000e+00> : vector<8x128xf32>
    %22 = tpu.matmul %20, %21, %cst_12 {dimension_numbers = #tpu.dot_dimension_numbers<[1], [0], [0], [1], [0, 0, 1, 1], [], []>} : vector<8x8xf32>, vector<8x128xf32>, vector<8x128xf32> -> vector<8x128xf32>
    %23 = arith.mulf %17, %19 : vector<8x8xf32>
    %c0_13 = arith.constant 0 : index
    %c0_14 = arith.constant 0 : index
    %24 = vector.load %arg5[%c0_13, %c0_14] : memref<8x128xf32, #tpu.memory_space<vmem>>, vector<8x128xf32>
    %cst_15 = arith.constant dense<0.000000e+00> : vector<8x128xf32>
    %25 = tpu.matmul %23, %24, %cst_15 {dimension_numbers = #tpu.dot_dimension_numbers<[1], [0], [0], [1], [0, 0, 1, 1], [], []>} : vector<8x8xf32>, vector<8x128xf32>, vector<8x128xf32> -> vector<8x128xf32>
    %c0_16 = arith.constant 0 : index
    %c0_17 = arith.constant 0 : index
    %26 = vector.load %arg7[%c0_16, %c0_17] : memref<4x1xf32, #tpu.memory_space<vmem>>, vector<4x1xf32>
    %cst_18 = arith.constant 0.000000e+00 : f32
    %27 = vector.broadcast %cst_18 : f32 to vector<8x128xf32>
    %28 = vector.extract_strided_slice %6 {offsets = [0, 0], sizes = [8, 128], strides = [1, 1]} : vector<32x128xf32> to vector<8x128xf32>
    %29 = arith.truncf %28 : vector<8x128xf32> to vector<8x128xbf16>
    %c0_19 = arith.constant 0 : index
    %c0_20 = arith.constant 0 : index
    %c0_21 = arith.constant 0 : index
    %30 = vector.load %arg6[%c0_19, %c0_20, %c0_21] : memref<4x128x256xbf16, #tpu.memory_space<vmem>>, vector<1x128x256xbf16>
    %31 = vector.shape_cast %30 : vector<1x128x256xbf16> to vector<128x256xbf16>
    %cst_22 = arith.constant dense<0.000000e+00> : vector<8x256xf32>
    %32 = tpu.matmul %29, %31, %cst_22 {dimension_numbers = #tpu.dot_dimension_numbers<[1], [0], [0], [1], [0, 0, 1, 1], [], []>} : vector<8x128xbf16>, vector<128x256xbf16>, vector<8x256xf32> -> vector<8x256xf32>
    %33 = vector.extract_strided_slice %32 {offsets = [0, 0], sizes = [8, 128], strides = [1, 1]} : vector<8x256xf32> to vector<8x128xf32>
    %34 = arith.mulf %22, %33 : vector<8x128xf32>
    %35 = vector.extract_strided_slice %32 {offsets = [0, 128], sizes = [8, 128], strides = [1, 1]} : vector<8x256xf32> to vector<8x128xf32>
    %36 = arith.mulf %25, %35 : vector<8x128xf32>
    %37 = arith.addf %34, %36 : vector<8x128xf32>
    %38 = vector.extract_strided_slice %26 {offsets = [0, 0], sizes = [1, 1], strides = [1, 1]} : vector<4x1xf32> to vector<1x1xf32>
    %39 = vector.broadcast %38 : vector<1x1xf32> to vector<8x128xf32>
    %40 = arith.mulf %37, %39 : vector<8x128xf32>
    %41 = math.tanh %40 : vector<8x128xf32>
    %42 = arith.addf %27, %41 : vector<8x128xf32>
    %43 = vector.extract_strided_slice %6 {offsets = [8, 0], sizes = [8, 128], strides = [1, 1]} : vector<32x128xf32> to vector<8x128xf32>
    %44 = arith.truncf %43 : vector<8x128xf32> to vector<8x128xbf16>
    %c1 = arith.constant 1 : index
    %c0_23 = arith.constant 0 : index
    %c0_24 = arith.constant 0 : index
    %45 = vector.load %arg6[%c1, %c0_23, %c0_24] : memref<4x128x256xbf16, #tpu.memory_space<vmem>>, vector<1x128x256xbf16>
    %46 = vector.shape_cast %45 : vector<1x128x256xbf16> to vector<128x256xbf16>
    %cst_25 = arith.constant dense<0.000000e+00> : vector<8x256xf32>
    %47 = tpu.matmul %44, %46, %cst_25 {dimension_numbers = #tpu.dot_dimension_numbers<[1], [0], [0], [1], [0, 0, 1, 1], [], []>} : vector<8x128xbf16>, vector<128x256xbf16>, vector<8x256xf32> -> vector<8x256xf32>
    %48 = vector.extract_strided_slice %47 {offsets = [0, 0], sizes = [8, 128], strides = [1, 1]} : vector<8x256xf32> to vector<8x128xf32>
    %49 = arith.mulf %22, %48 : vector<8x128xf32>
    %50 = vector.extract_strided_slice %47 {offsets = [0, 128], sizes = [8, 128], strides = [1, 1]} : vector<8x256xf32> to vector<8x128xf32>
    %51 = arith.mulf %25, %50 : vector<8x128xf32>
    %52 = arith.addf %49, %51 : vector<8x128xf32>
    %53 = vector.extract_strided_slice %26 {offsets = [1, 0], sizes = [1, 1], strides = [1, 1]} : vector<4x1xf32> to vector<1x1xf32>
    %54 = vector.broadcast %53 : vector<1x1xf32> to vector<8x128xf32>
    %55 = arith.mulf %52, %54 : vector<8x128xf32>
    %56 = math.tanh %55 : vector<8x128xf32>
    %57 = arith.addf %42, %56 : vector<8x128xf32>
    %58 = vector.extract_strided_slice %6 {offsets = [16, 0], sizes = [8, 128], strides = [1, 1]} : vector<32x128xf32> to vector<8x128xf32>
    %59 = arith.truncf %58 : vector<8x128xf32> to vector<8x128xbf16>
    %c2 = arith.constant 2 : index
    %c0_26 = arith.constant 0 : index
    %c0_27 = arith.constant 0 : index
    %60 = vector.load %arg6[%c2, %c0_26, %c0_27] : memref<4x128x256xbf16, #tpu.memory_space<vmem>>, vector<1x128x256xbf16>
    %61 = vector.shape_cast %60 : vector<1x128x256xbf16> to vector<128x256xbf16>
    %cst_28 = arith.constant dense<0.000000e+00> : vector<8x256xf32>
    %62 = tpu.matmul %59, %61, %cst_28 {dimension_numbers = #tpu.dot_dimension_numbers<[1], [0], [0], [1], [0, 0, 1, 1], [], []>} : vector<8x128xbf16>, vector<128x256xbf16>, vector<8x256xf32> -> vector<8x256xf32>
    %63 = vector.extract_strided_slice %62 {offsets = [0, 0], sizes = [8, 128], strides = [1, 1]} : vector<8x256xf32> to vector<8x128xf32>
    %64 = arith.mulf %22, %63 : vector<8x128xf32>
    %65 = vector.extract_strided_slice %62 {offsets = [0, 128], sizes = [8, 128], strides = [1, 1]} : vector<8x256xf32> to vector<8x128xf32>
    %66 = arith.mulf %25, %65 : vector<8x128xf32>
    %67 = arith.addf %64, %66 : vector<8x128xf32>
    %68 = vector.extract_strided_slice %26 {offsets = [2, 0], sizes = [1, 1], strides = [1, 1]} : vector<4x1xf32> to vector<1x1xf32>
    %69 = vector.broadcast %68 : vector<1x1xf32> to vector<8x128xf32>
    %70 = arith.mulf %67, %69 : vector<8x128xf32>
    %71 = math.tanh %70 : vector<8x128xf32>
    %72 = arith.addf %57, %71 : vector<8x128xf32>
    %73 = vector.extract_strided_slice %6 {offsets = [24, 0], sizes = [8, 128], strides = [1, 1]} : vector<32x128xf32> to vector<8x128xf32>
    %74 = arith.truncf %73 : vector<8x128xf32> to vector<8x128xbf16>
    %c3 = arith.constant 3 : index
    %c0_29 = arith.constant 0 : index
    %c0_30 = arith.constant 0 : index
    %75 = vector.load %arg6[%c3, %c0_29, %c0_30] : memref<4x128x256xbf16, #tpu.memory_space<vmem>>, vector<1x128x256xbf16>
    %76 = vector.shape_cast %75 : vector<1x128x256xbf16> to vector<128x256xbf16>
    %cst_31 = arith.constant dense<0.000000e+00> : vector<8x256xf32>
    %77 = tpu.matmul %74, %76, %cst_31 {dimension_numbers = #tpu.dot_dimension_numbers<[1], [0], [0], [1], [0, 0, 1, 1], [], []>} : vector<8x128xbf16>, vector<128x256xbf16>, vector<8x256xf32> -> vector<8x256xf32>
    %78 = vector.extract_strided_slice %77 {offsets = [0, 0], sizes = [8, 128], strides = [1, 1]} : vector<8x256xf32> to vector<8x128xf32>
    %79 = arith.mulf %22, %78 : vector<8x128xf32>
    %80 = vector.extract_strided_slice %77 {offsets = [0, 128], sizes = [8, 128], strides = [1, 1]} : vector<8x256xf32> to vector<8x128xf32>
    %81 = arith.mulf %25, %80 : vector<8x128xf32>
    %82 = arith.addf %79, %81 : vector<8x128xf32>
    %83 = vector.extract_strided_slice %26 {offsets = [3, 0], sizes = [1, 1], strides = [1, 1]} : vector<4x1xf32> to vector<1x1xf32>
    %84 = vector.broadcast %83 : vector<1x1xf32> to vector<8x128xf32>
    %85 = arith.mulf %82, %84 : vector<8x128xf32>
    %86 = math.tanh %85 : vector<8x128xf32>
    %87 = arith.addf %72, %86 : vector<8x128xf32>
    %c0_32 = arith.constant 0 : index
    %c0_33 = arith.constant 0 : index
    %88 = vector.load %arg8[%c0_32, %c0_33] : memref<8x128xf32, #tpu.memory_space<vmem>>, vector<8x128xf32>
    tpu.vector_store %arg8[%c0_32, %c0_33], %87 {strides = array<i32>} : memref<8x128xf32, #tpu.memory_space<vmem>>, vector<8x128xf32>,
    return
  }
  func.func @transform_0(%arg0: i32) -> (i32, i32, i32) {
    %c0_i32 = arith.constant 0 : i32
    %c0_i32_0 = arith.constant 0 : i32
    %c0_i32_1 = arith.constant 0 : i32
    return %arg0, %c0_i32, %c0_i32_0 : i32, i32, i32
  }
  func.func @transform_1(%arg0: i32) -> (i32, i32, i32) {
    %c0_i32 = arith.constant 0 : i32
    %c0_i32_0 = arith.constant 0 : i32
    %c0_i32_1 = arith.constant 0 : i32
    return %arg0, %c0_i32, %c0_i32_0 : i32, i32, i32
  }
  func.func @transform_2(%arg0: i32) -> (i32, i32, i32) {
    %c0_i32 = arith.constant 0 : i32
    %c0_i32_0 = arith.constant 0 : i32
    %c0_i32_1 = arith.constant 0 : i32
    return %arg0, %c0_i32, %c0_i32_0 : i32, i32, i32
  }
  func.func @transform_3(%arg0: i32) -> (i32, i32) {
    %c0_i32 = arith.constant 0 : i32
    %c0_i32_0 = arith.constant 0 : i32
    %c0_i32_1 = arith.constant 0 : i32
    return %c0_i32, %c0_i32_0 : i32, i32
  }
  func.func @transform_4(%arg0: i32) -> (i32, i32) {
    %c0_i32 = arith.constant 0 : i32
    %c0_i32_0 = arith.constant 0 : i32
    %c0_i32_1 = arith.constant 0 : i32
    return %c0_i32, %c0_i32_0 : i32, i32
  }
  func.func @transform_5(%arg0: i32) -> (i32, i32, i32) {
    %c0_i32 = arith.constant 0 : i32
    %c0_i32_0 = arith.constant 0 : i32
    %c0_i32_1 = arith.constant 0 : i32
    %c0_i32_2 = arith.constant 0 : i32
    return %c0_i32, %c0_i32_0, %c0_i32_1 : i32, i32, i32
  }
  func.func @transform_6(%arg0: i32) -> (i32, i32) {
    %c0_i32 = arith.constant 0 : i32
    %c0_i32_0 = arith.constant 0 : i32
    %c0_i32_1 = arith.constant 0 : i32
    return %c0_i32, %c0_i32_0 : i32, i32
  }
  func.func @transform_7(%arg0: i32) -> (i32, i32) {
    %c0_i32 = arith.constant 0 : i32
    %c0_i32_0 = arith.constant 0 : i32
    return %arg0, %c0_i32 : i32, i32
  }
}

module attributes {stable_mosaic.version = 11 : i64} {
  func.func @_resonance_kernel(%arg0: i32, %arg1: memref<1x32x8xf32, #tpu.memory_space<vmem>>, %arg2: memref<1x16x8xf32, #tpu.memory_space<vmem>>, %arg3: memref<1x32x128xf32, #tpu.memory_space<vmem>>, %arg4: memref<8x128xf32, #tpu.memory_space<vmem>>, %arg5: memref<8x128xf32, #tpu.memory_space<vmem>>, %arg6: memref<4x128x256xbf16, #tpu.memory_space<vmem>>, %arg7: memref<4x1xf32, #tpu.memory_space<vmem>>, %arg8: memref<8x128xf32, #tpu.memory_space<vmem>>) attributes {dimension_semantics = [#tpu.dimension_semantics<parallel>], iteration_bounds = array<i64: 1>, scalar_prefetch = 0 : i64, scratch_operands = 0 : i64, tpu.core_type = #tpu.core_type<tc>, window_params = [{transform_indices = @transform_0, window_bounds = array<i64: 1, 32, 8>}, {transform_indices = @transform_1, window_bounds = array<i64: 1, 16, 8>}, {transform_indices = @transform_2, window_bounds = array<i64: 1, 32, 128>}, {pipeline_mode = #tpu.pipeline_mode<synchronous>, transform_indices = @transform_3, window_bounds = array<i64: 8, 128>}, {pipeline_mode = #tpu.pipeline_mode<synchronous>, transform_indices = @transform_4, window_bounds = array<i64: 8, 128>}, {pipeline_mode = #tpu.pipeline_mode<synchronous>, transform_indices = @transform_5, window_bounds = array<i64: 4, 128, 256>}, {pipeline_mode = #tpu.pipeline_mode<synchronous>, transform_indices = @transform_6, window_bounds = array<i64: 4, 1>}, {transform_indices = @transform_7, window_bounds = array<i64: 8, 128>}]} {
    %c0 = arith.constant 0 : index
    %c0_0 = arith.constant 0 : index
    %c0_1 = arith.constant 0 : index
    %0 = vector.load %arg1[%c0, %c0_0, %c0_1] : memref<1x32x8xf32, #tpu.memory_space<vmem>>, vector<1x32x8xf32>
    %1 = vector.shape_cast %0 : vector<1x32x8xf32> to vector<32x8xf32>
    %c0_2 = arith.constant 0 : index
    %c0_3 = arith.constant 0 : index
    %2 = vector.load %arg4[%c0_2, %c0_3] : memref<8x128xf32, #tpu.memory_space<vmem>>, vector<8x128xf32>
    %cst = arith.constant dense<0.000000e+00> : vector<32x128xf32>
    %3 = tpu.matmul %1, %2, %cst {dimension_numbers = #tpu.dot_dimension_numbers<[1], [0], [0], [1], [0, 0, 1, 1], [], []>} : vector<32x8xf32>, vector<8x128xf32>, vector<32x128xf32> -> vector<32x128xf32>
    %c0_4 = arith.constant 0 : index
    %c0_5 = arith.constant 0 : index
    %c0_6 = arith.constant 0 : index
    %4 = vector.load %arg3[%c0_4, %c0_5, %c0_6] : memref<1x32x128xf32, #tpu.memory_space<vmem>>, vector<1x32x128xf32>
    %5 = vector.shape_cast %4 : vector<1x32x128xf32> to vector<32x128xf32>
    %6 = arith.mulf %3, %5 : vector<32x128xf32>
    %c0_7 = arith.constant 0 : index
    %c0_8 = arith.constant 0 : index
    %c0_9 = arith.constant 0 : index
    %7 = vector.load %arg2[%c0_7, %c0_8, %c0_9] : memref<1x16x8xf32, #tpu.memory_space<vmem>>, vector<1x16x8xf32>
    %8 = vector.shape_cast %7 : vector<1x16x8xf32> to vector<16x8xf32>
    %9 = vector.extract_strided_slice %8 {offsets = [0, 0], sizes = [8, 8], strides = [1, 1]} : vector<16x8xf32> to vector<8x8xf32>
    %10 = vector.extract_strided_slice %8 {offsets = [8, 0], sizes = [8, 8], strides = [1, 1]} : vector<16x8xf32> to vector<8x8xf32>
    %11 = arith.maximumf %9, %10 : vector<8x8xf32>
    %12 = vector.extract_strided_slice %8 {offsets = [0, 0], sizes = [8, 8], strides = [1, 1]} : vector<16x8xf32> to vector<8x8xf32>
    %13 = arith.subf %12, %11 : vector<8x8xf32>
    %14 = math.exp %13 : vector<8x8xf32>
    %15 = vector.extract_strided_slice %8 {offsets = [8, 0], sizes = [8, 8], strides = [1, 1]} : vector<16x8xf32> to vector<8x8xf32>
    %16 = arith.subf %15, %11 : vector<8x8xf32>
    %17 = math.exp %16 : vector<8x8xf32>
    %18 = arith.addf %14, %17 : vector<8x8xf32>
    %19 = tpu.reciprocal %18 {approx = true} : vector<8x8xf32> -> vector<8x8xf32>
    %20 = arith.mulf %14, %19 : vector<8x8xf32>
    %c0_10 = arith.constant 0 : index
    %c0_11 = arith.constant 0 : index
    %21 = vector.load %arg5[%c0_10, %c0_11] : memref<8x128xf32, #tpu.memory_space<vmem>>, vector<8x128xf32>
    %cst_12 = arith.constant dense<0.000000e+00> : vector<8x128xf32>
    %22 = tpu.matmul %20, %21, %cst_12 {dimension_numbers = #tpu.dot_dimension_numbers<[1], [0], [0], [1], [0, 0, 1, 1], [], []>} : vector<8x8xf32>, vector<8x128xf32>, vector<8x128xf32> -> vector<8x128xf32>
    %23 = arith.mulf %17, %19 : vector<8x8xf32>
    %c0_13 = arith.constant 0 : index
    %c0_14 = arith.constant 0 : index
    %24 = vector.load %arg5[%c0_13, %c0_14] : memref<8x128xf32, #tpu.memory_space<vmem>>, vector<8x128xf32>
    %cst_15 = arith.constant dense<0.000000e+00> : vector<8x128xf32>
    %25 = tpu.matmul %23, %24, %cst_15 {dimension_numbers = #tpu.dot_dimension_numbers<[1], [0], [0], [1], [0, 0, 1, 1], [], []>} : vector<8x8xf32>, vector<8x128xf32>, vector<8x128xf32> -> vector<8x128xf32>
    %c0_16 = arith.constant 0 : index
    %c0_17 = arith.constant 0 : index
    %26 = vector.load %arg7[%c0_16, %c0_17] : memref<4x1xf32, #tpu.memory_space<vmem>>, vector<4x1xf32>
    %cst_18 = arith.constant 0.000000e+00 : f32
    %27 = vector.broadcast %cst_18 : f32 to vector<8x128xf32>
    %28 = vector.extract_strided_slice %6 {offsets = [0, 0], sizes = [8, 128], strides = [1, 1]} : vector<32x128xf32> to vector<8x128xf32>
    %29 = arith.truncf %28 : vector<8x128xf32> to vector<8x128xbf16>
    %c0_19 = arith.constant 0 : index
    %c0_20 = arith.constant 0 : index
    %c0_21 = arith.constant 0 : index
    %30 = vector.load %arg6[%c0_19, %c0_20, %c0_21] : memref<4x128x256xbf16, #tpu.memory_space<vmem>>, vector<1x128x256xbf16>
    %31 = vector.shape_cast %30 : vector<1x128x256xbf16> to vector<128x256xbf16>
    %cst_22 = arith.constant dense<0.000000e+00> : vector<8x256xf32>
    %32 = tpu.matmul %29, %31, %cst_22 {dimension_numbers = #tpu.dot_dimension_numbers<[1], [0], [0], [1], [0, 0, 1, 1], [], []>} : vector<8x128xbf16>, vector<128x256xbf16>, vector<8x256xf32> -> vector<8x256xf32>
    %33 = vector.extract_strided_slice %32 {offsets = [0, 0], sizes = [8, 128], strides = [1, 1]} : vector<8x256xf32> to vector<8x128xf32>
    %34 = arith.mulf %22, %33 : vector<8x128xf32>
    %35 = vector.extract_strided_slice %32 {offsets = [0, 128], sizes = [8, 128], strides = [1, 1]} : vector<8x256xf32> to vector<8x128xf32>
    %36 = arith.mulf %25, %35 : vector<8x128xf32>
    %37 = arith.addf %34, %36 : vector<8x128xf32>
    %38 = vector.extract_strided_slice %26 {offsets = [0, 0], sizes = [1, 1], strides = [1, 1]} : vector<4x1xf32> to vector<1x1xf32>
    %39 = vector.broadcast %38 : vector<1x1xf32> to vector<8x128xf32>
    %40 = arith.mulf %37, %39 : vector<8x128xf32>
    %41 = math.tanh %40 : vector<8x128xf32>
    %42 = arith.addf %27, %41 : vector<8x128xf32>
    %43 = vector.extract_strided_slice %6 {offsets = [8, 0], sizes = [8, 128], strides = [1, 1]} : vector<32x128xf32> to vector<8x128xf32>
    %44 = arith.truncf %43 : vector<8x128xf32> to vector<8x128xbf16>
    %c1 = arith.constant 1 : index
    %c0_23 = arith.constant 0 : index
    %c0_24 = arith.constant 0 : index
    %45 = vector.load %arg6[%c1, %c0_23, %c0_24] : memref<4x128x256xbf16, #tpu.memory_space<vmem>>, vector<1x128x256xbf16>
    %46 = vector.shape_cast %45 : vector<1x128x256xbf16> to vector<128x256xbf16>
    %cst_25 = arith.constant dense<0.000000e+00> : vector<8x256xf32>
    %47 = tpu.matmul %44, %46, %cst_25 {dimension_numbers = #tpu.dot_dimension_numbers<[1], [0], [0], [1], [0, 0, 1, 1], [], []>} : vector<8x128xbf16>, vector<128x256xbf16>, vector<8x256xf32> -> vector<8x256xf32>
    %48 = vector.extract_strided_slice %47 {offsets = [0, 0], sizes = [8, 128], strides = [1, 1]} : vector<8x256xf32> to vector<8x128xf32>
    %49 = arith.mulf %22, %48 : vector<8x128xf32>
    %50 = vector.extract_strided_slice %47 {offsets = [0, 128], sizes = [8, 128], strides = [1, 1]} : vector<8x256xf32> to vector<8x128xf32>
    %51 = arith.mulf %25, %50 : vector<8x128xf32>
    %52 = arith.addf %49, %51 : vector<8x128xf32>
    %53 = vector.extract_strided_slice %26 {offsets = [1, 0], sizes = [1, 1], strides = [1, 1]} : vector<4x1xf32> to vector<1x1xf32>
    %54 = vector.broadcast %53 : vector<1x1xf32> to vector<8x128xf32>
    %55 = arith.mulf %52, %54 : vector<8x128xf32>
    %56 = math.tanh %55 : vector<8x128xf32>
    %57 = arith.addf %42, %56 : vector<8x128xf32>
    %58 = vector.extract_strided_slice %6 {offsets = [16, 0], sizes = [8, 128], strides = [1, 1]} : vector<32x128xf32> to vector<8x128xf32>
    %59 = arith.truncf %58 : vector<8x128xf32> to vector<8x128xbf16>
    %c2 = arith.constant 2 : index
    %c0_26 = arith.constant 0 : index
    %c0_27 = arith.constant 0 : index
    %60 = vector.load %arg6[%c2, %c0_26, %c0_27] : memref<4x128x256xbf16, #tpu.memory_space<vmem>>, vector<1x128x256xbf16>
    %61 = vector.shape_cast %60 : vector<1x128x256xbf16> to vector<128x256xbf16>
    %cst_28 = arith.constant dense<0.000000e+00> : vector<8x256xf32>
    %62 = tpu.matmul %59, %61, %cst_28 {dimension_numbers = #tpu.dot_dimension_numbers<[1], [0], [0], [1], [0, 0, 1, 1], [], []>} : vector<8x128xbf16>, vector<128x256xbf16>, vector<8x256xf32> -> vector<8x256xf32>
    %63 = vector.extract_strided_slice %62 {offsets = [0, 0], sizes = [8, 128], strides = [1, 1]} : vector<8x256xf32> to vector<8x128xf32>
    %64 = arith.mulf %22, %63 : vector<8x128xf32>
    %65 = vector.extract_strided_slice %62 {offsets = [0, 128], sizes = [8, 128], strides = [1, 1]} : vector<8x256xf32> to vector<8x128xf32>
    %66 = arith.mulf %25, %65 : vector<8x128xf32>
    %67 = arith.addf %64, %66 : vector<8x128xf32>
    %68 = vector.extract_strided_slice %26 {offsets = [2, 0], sizes = [1, 1], strides = [1, 1]} : vector<4x1xf32> to vector<1x1xf32>
    %69 = vector.broadcast %68 : vector<1x1xf32> to vector<8x128xf32>
    %70 = arith.mulf %67, %69 : vector<8x128xf32>
    %71 = math.tanh %70 : vector<8x128xf32>
    %72 = arith.addf %57, %71 : vector<8x128xf32>
    %73 = vector.extract_strided_slice %6 {offsets = [24, 0], sizes = [8, 128], strides = [1, 1]} : vector<32x128xf32> to vector<8x128xf32>
    %74 = arith.truncf %73 : vector<8x128xf32> to vector<8x128xbf16>
    %c3 = arith.constant 3 : index
    %c0_29 = arith.constant 0 : index
    %c0_30 = arith.constant 0 : index
    %75 = vector.load %arg6[%c3, %c0_29, %c0_30] : memref<4x128x256xbf16, #tpu.memory_space<vmem>>, vector<1x128x256xbf16>
    %76 = vector.shape_cast %75 : vector<1x128x256xbf16> to vector<128x256xbf16>
    %cst_31 = arith.constant dense<0.000000e+00> : vector<8x256xf32>
    %77 = tpu.matmul %74, %76, %cst_31 {dimension_numbers = #tpu.dot_dimension_numbers<[1], [0], [0], [1], [0, 0, 1, 1], [], []>} : vector<8x128xbf16>, vector<128x256xbf16>, vector<8x256xf32> -> vector<8x256xf32>
    %78 = vector.extract_strided_slice %77 {offsets = [0, 0], sizes = [8, 128], strides = [1, 1]} : vector<8x256xf32> to vector<8x128xf32>
    %79 = arith.mulf %22, %78 : vector<8x128xf32>
    %80 = vector.extract_strided_slice %77 {offsets = [0, 128], sizes = [8, 128], strides = [1, 1]} : vector<8x256xf32> to vector<8x128xf32>
    %81 = arith.mulf %25, %80 : vector<8x128xf32>
    %82 = arith.addf %79, %81 : vector<8x128xf32>
    %83 = vector.extract_strided_slice %26 {offsets = [3, 0], sizes = [1, 1], strides = [1, 1]} : vector<4x1xf32> to vector<1x1xf32>
    %84 = vector.broadcast %83 : vector<1x1xf32> to vector<8x128xf32>
    %85 = arith.mulf %82, %84 : vector<8x128xf32>
    %86 = math.tanh %85 : vector<8x128xf32>
    %87 = arith.addf %72, %86 : vector<8x128xf32>
    %c0_32 = arith.constant 0 : index
    %c0_33 = arith.constant 0 : index
    %88 = vector.load %arg8[%c0_32, %c0_33] : memref<8x128xf32, #tpu.memory_space<vmem>>, vector<8x128xf32>
    tpu.vector_store %arg8[%c0_32, %c0_33], %87 {strides = array<i32>} : memref<8x128xf32, #tpu.memory_space<vmem>>, vector<8x128xf32>,
    return
  }
  func.func @transform_0(%arg0: i32) -> (i32, i32, i32) {
    %c0_i32 = arith.constant 0 : i32
    %c0_i32_0 = arith.constant 0 : i32
    %c0_i32_1 = arith.constant 0 : i32
    return %arg0, %c0_i32, %c0_i32_0 : i32, i32, i32
  }
  func.func @transform_1(%arg0: i32) -> (i32, i32, i32) {
    %c0_i32 = arith.constant 0 : i32
    %c0_i32_0 = arith.constant 0 : i32
    %c0_i32_1 = arith.constant 0 : i32
    return %arg0, %c0_i32, %c0_i32_0 : i32, i32, i32
  }
  func.func @transform_2(%arg0: i32) -> (i32, i32, i32) {
    %c0_i32 = arith.constant 0 : i32
    %c0_i32_0 = arith.constant 0 : i32
    %c0_i32_1 = arith.constant 0 : i32
    return %arg0, %c0_i32, %c0_i32_0 : i32, i32, i32
  }
  func.func @transform_3(%arg0: i32) -> (i32, i32) {
    %c0_i32 = arith.constant 0 : i32
    %c0_i32_0 = arith.constant 0 : i32
    %c0_i32_1 = arith.constant 0 : i32
    return %c0_i32, %c0_i32_0 : i32, i32
  }
  func.func @transform_4(%arg0: i32) -> (i32, i32) {
    %c0_i32 = arith.constant 0 : i32
    %c0_i32_0 = arith.constant 0 : i32
    %c0_i32_1 = arith.constant 0 : i32
    return %c0_i32, %c0_i32_0 : i32, i32
  }
  func.func @transform_5(%arg0: i32) -> (i32, i32, i32) {
    %c0_i32 = arith.constant 0 : i32
    %c0_i32_0 = arith.constant 0 : i32
    %c0_i32_1 = arith.constant 0 : i32
    %c0_i32_2 = arith.constant 0 : i32
    return %c0_i32, %c0_i32_0, %c0_i32_1 : i32, i32, i32
  }
  func.func @transform_6(%arg0: i32) -> (i32, i32) {
    %c0_i32 = arith.constant 0 : i32
    %c0_i32_0 = arith.constant 0 : i32
    %c0_i32_1 = arith.constant 0 : i32
    return %c0_i32, %c0_i32_0 : i32, i32
  }
  func.func @transform_7(%arg0: i32) -> (i32, i32) {
    %c0_i32 = arith.constant 0 : i32
    %c0_i32_0 = arith.constant 0 : i32
    return %arg0, %c0_i32 : i32, i32
  }
}

</mosaic_0001>

<bundles_post_ra>
// kernel: tpu_custom_call.1
= control target key start
LH: loop header
LB: loop body
LE: loop exit
PB: predicated region body
PF: predicated region fallthrough
CT: control target
= control target key end

     0   :  { %12 = vsyncpa [#allocation3], 0  ;;  %s1317_s0 = inlined_call_operand.vmem [shape: f32[1,32,8], index: 0, kind: input, shape index: {}]   ;;  %s1318_s1 = inlined_call_operand.vmem [shape: f32[1,16,8], index: 1, kind: input, shape index: {}]   ;;  %s1319_s2 = inlined_call_operand.vmem [shape: f32[1,32,128], index: 2, kind: input, shape index: {}]   ;;  %s1320_s3 = inlined_call_operand.vmem [shape: f32[8,128], index: 3, kind: input, shape index: {}]   ;;  %s1321_s4 = inlined_call_operand.vmem [shape: f32[8,128], index: 4, kind: input, shape index: {}]   ;;  %s1322_s5 = inlined_call_operand.hbm [shape: bf16[4,128,256], index: 5, kind: input, shape index: {}]   ;;  %s1323_s6 = inlined_call_operand.vmem [shape: f32[4,1], index: 6, kind: input, shape index: {}]   ;;  %s1324_s7 = inlined_call_operand.hbm [shape: f32[8,128], index: 7, kind: output, shape index: {}]  }
   0x1   :  { %13 = vsyncpa [#allocation4], 0  ;;  %s1195_s24 = smov [#allocation2]   ;;  %s1147_s28 = scalar_lea.hbm %s1322_s5, 8192 }
   0x2   :  { %s29_s25 = sshll.u32 %s1195_s24, 4  ;;  %p1148_p0 = scmp.ne.s32.totalorder %s1322_s5, %s1147_s28  ;;  %s30_s25 = int_to_ptr.vmem [resolvable:$true] %s29_s25 }
   0x3   :  { %p1151_p1 = scmp.lt.u32.totalorder %s1147_s28, %s1322_s5 }
   0x5   :  { %p1153_p2 = pnand %p1151_p1, %p1148_p0 }
   0x7   :  { %1156 = shalt.err (!%p1153_p2)
}
   0x8   :  { %s1157_s10 = scalar_lea.vmem %s30_s25, 8192  ;;  %p1162_p4 = scmp.lt.s32.totalorder %s30_s25, %s30_s25 }
   0x9   :  { %p1158_p3 = scmp.ne.s32.totalorder %s30_s25, %s1157_s10  ;;  %p1163_p5 = scmp.lt.s32.totalorder %s1157_s10, %s1157_s10 }
   0xb   :  { %p1164_p6 = por %p1163_p5, %p1162_p4 }
   0xd   :  { %p1165_p7 = pnand %p1164_p6, %p1158_p3 }
   0xf   :  { %1168 = shalt.err (!%p1165_p7)
}
  0x10   :  { %s1196_s11 = smov 128   ;;  %s1197_s12 = smov 8  }
  0x11   :  { %35 = dma.hbm_to_vmem [thread:$0]  %s1322_s5, 8192, %s30_s25, [#allocation3], %s1196_s11, %s1196_s11, %s1197_s12  }
  0x12   :  { %1191 = dma.done.wait [#allocation3], 8192  }
  0x13   :  { %1192 = vsyncadd [#allocation3], 4294959104  ;;  %v1198_v0 = vmov 0.0   ;;  %vm1199_vm0 = vmmov 0   ;;  %vm47_vm1 = vcmask 64512   ;;  %v46_v1 = vld [vmem:[%s1320_s3] sm:$0xff] }
  0x14   :  { %1012 = vmatprep.subr.mxu1 %v1198_v0  ;;  %1014 = vmatprep.mubr.msk.f32.mxu1 %vm1199_vm0, %v1198_v0  ;;  %v42_v2 = vld [vmem:[%s1317_s0] sm:$0xff]  ;;  %v43_v3 = vld [vmem:[%s1317_s0 + $0x8] sm:$0xff]  ;;  %v44_v4 = vld [vmem:[%s1317_s0 + $0x10] sm:$0xff]  ;;  %v1200_v54 = vmov 0   ;;  %s1201_s15 = smov [#allocation5]  }
  0x15   :  { %1004 = vmatprep.subr.mxu0 %v46_v1  ;;  %1006 = vmatprep.mubr.msk.f32.mxu0 %vm47_vm1, %v42_v2  ;;  %v165_v5 = vld [vmem:[%s1321_s4] sm:$0xff]  ;;  %v154_v7 = vld [vmem:[%s1318_s1 + $0x8] sm:$0xff]  ;;  %v45_v8 = vld [vmem:[%s1317_s0 + $0x18] sm:$0xff]  ;;  %s916_s16 = sshll.u32 %s1201_s15, 4  ;;  %s917_s16 = int_to_ptr.vmem [resolvable:$true] %s916_s16 }
  0x16   :  { %1005 = vmatpush3.msra.mxu0 %v46_v1  ;;  %1013 = vmatpush3.msra.mxu1 %v165_v5  ;;  %v153_v6 = vld [vmem:[%s1318_s1] sm:$0xff]  ;;  %v1046_v16 = vld [vmem:[#allocation2 + $0x10] ss:$8 sps:$4 sm:$0xff]   ;;  %v1048_v17 = vld [vmem:[#allocation2 + $0x14] ss:$8 sps:$4 sm:$0xff]   ;;  %s1169_s17 = scalar_lea.vmem %s917_s16, 128  ;;  %p1174_p9 = scmp.lt.s32.totalorder %s917_s16, %s917_s16 }
  0x17   :  { %1007 = vmatmul.mubr.msk.f32.vlgmr.msra.gmra.mrb[0].mxu0 %vm47_vm1, %v43_v3  ;;  %v155_v9 = vmax.f32 %v153_v6, %v154_v7  ;;  %1017 = vmatprep.subr.mxu1 %v1198_v0  ;;  %v1040_v10 = vld [vmem:[#allocation2] ss:$8 sps:$4 sm:$0xff]   ;;  %v1042_v13 = vld [vmem:[#allocation2 + $0x4] ss:$8 sps:$4 sm:$0xff]   ;;  %v1060_v20 = vld [vmem:[#allocation2 + $0x34] ss:$8 sps:$4 sm:$0xff]   ;;  %p1170_p8 = scmp.ne.s32.totalorder %s917_s16, %s1169_s17  ;;  %p1175_p10 = scmp.lt.s32.totalorder %s1169_s17, %s1169_s17 }
  0x18   :  { %1009 = vmatprep.mubr.msk.f32.mxu0 %vm47_vm1, %v44_v4  ;;  %411 = vmatprep.subr.bf16.mxu0 %v1042_v13  ;;  %v1054_v18 = vld [vmem:[#allocation2 + $0x24] ss:$8 sps:$4 sm:$0xff]   ;;  %v1052_v19 = vld [vmem:[#allocation2 + $0x20] ss:$8 sps:$4 sm:$0xff]   ;;  %v1058_v21 = vld [vmem:[#allocation2 + $0x30] ss:$8 sps:$4 sm:$0xff]  }
  0x19   :  { %v156_v11 = vsub.f32 %v153_v6, %v155_v9  ;;  %v159_v12 = vsub.f32 %v154_v7, %v155_v9  ;;  %412 = vmatpush1.bf16.msra.mxu0 %v1040_v10  ;;  %v1066_v22 = vld [vmem:[#allocation2 + $0x44] ss:$8 sps:$4 sm:$0xff]   ;;  %v1064_v25 = vld [vmem:[#allocation2 + $0x40] ss:$8 sps:$4 sm:$0xff]   ;;  %v1072_v27 = vld [vmem:[#allocation2 + $0x54] ss:$8 sps:$4 sm:$0xff]   ;;  %p1176_p11 = por %p1175_p10, %p1174_p9 }
  0x1a   :  { %413 = vmatprep.subr.bf16.mxu0 %v1048_v17  ;;  %v1070_v28 = vld [vmem:[#allocation2 + $0x50] ss:$8 sps:$4 sm:$0xff]   ;;  %v1078_v29 = vld [vmem:[#allocation2 + $0x64] ss:$8 sps:$4 sm:$0xff]   ;;  %v1076_v30 = vld [vmem:[#allocation2 + $0x60] ss:$8 sps:$4 sm:$0xff]  }
  0x1b   :  { %1010 = vmatmul.mubr.msk.f32.gmra.mrb[2].mxu0 %vm47_vm1, %v45_v8  ;;  %v157_v14 = vmul.f32 1.442695, %v156_v11  ;;  %v160_v15 = vmul.f32 1.442695, %v159_v12  ;;  %v1039_v33 = vld [vmem:[#allocation2 + $0x84] ss:$8 sps:$4 sm:$0xff]   ;;  %p1177_p12 = pnand %p1176_p11, %p1170_p8 }
  0x1c   :  { %v1037_v35 = vld [vmem:[#allocation2 + $0x80] ss:$8 sps:$4 sm:$0xff]   ;;  %v1045_v36 = vld [vmem:[#allocation2 + $0x94] ss:$8 sps:$4 sm:$0xff]   ;;  %v1043_v37 = vld [vmem:[#allocation2 + $0x90] ss:$8 sps:$4 sm:$0xff]   ;;  %443 = vmatprep.mubr.bf16.mxu0 %v1200_v54 }
  0x1d   :  { %1133 = vpow2.f32 %v157_v14  ;;  %414 = vmatpush1.bf16.msra.mxu0 %v1046_v16  ;;  %v1051_v38 = vld [vmem:[#allocation2 + $0xa4] ss:$8 sps:$4 sm:$0xff]   ;;  %v1049_v39 = vld [vmem:[#allocation2 + $0xa0] ss:$8 sps:$4 sm:$0xff]   ;;  %v1057_v40 = vld [vmem:[#allocation2 + $0xb4] ss:$8 sps:$4 sm:$0xff]  }
  0x1e   :  { %1135 = vpow2.f32 %v160_v15  ;;  %415 = vmatprep.subr.bf16.mxu0 %v1054_v18  ;;  %v1055_v41 = vld [vmem:[#allocation2 + $0xb0] ss:$8 sps:$4 sm:$0xff]   ;;  %v1063_v42 = vld [vmem:[#allocation2 + $0xc4] ss:$8 sps:$4 sm:$0xff]   ;;  %v1061_v43 = vld [vmem:[#allocation2 + $0xc0] ss:$8 sps:$4 sm:$0xff]  }
  0x1f   :  { %v1069_v44 = vld [vmem:[#allocation2 + $0xd4] ss:$8 sps:$4 sm:$0xff]   ;;  %v1067_v45 = vld [vmem:[#allocation2 + $0xd0] ss:$8 sps:$4 sm:$0xff]   ;;  %v1075_v46 = vld [vmem:[#allocation2 + $0xe4] ss:$8 sps:$4 sm:$0xff]  }
  0x20   :  { %v1073_v47 = vld [vmem:[#allocation2 + $0xe0] ss:$8 sps:$4 sm:$0xff]   ;;  %v1081_v48 = vld [vmem:[#allocation2 + $0xf4] ss:$8 sps:$4 sm:$0xff]   ;;  %v1079_v49 = vld [vmem:[#allocation2 + $0xf0] ss:$8 sps:$4 sm:$0xff]  }
  0x21   :  { %416 = vmatpush1.bf16.msra.mxu0 %v1052_v19  ;;  %v1084_v50 = vld [vmem:[#allocation2 + $0x74] ss:$8 sps:$4 sm:$0xff]   ;;  %v1082_v51 = vld [vmem:[#allocation2 + $0x70] ss:$8 sps:$4 sm:$0xff]   ;;  %v1087_v52 = vld [vmem:[#allocation2 + $0x184] ss:$8 sps:$4 sm:$0xff]  }
  0x22   :  { %417 = vmatprep.subr.bf16.mxu0 %v1060_v20  ;;  %v1090_v53 = vld [vmem:[#allocation2 + $0x104] ss:$8 sps:$4 sm:$0xff]   ;;  %v313_v55 = vld [vmem:[%s1323_s6] sm:$0xf]  ;;  %v1093_v4 = vld [vmem:[#allocation2 + $0x194] ss:$8 sps:$4 sm:$0xff]  }
  0x23   :  { %1022 = vpush %v313_v55  ;;  %v604_v56 = vrot.slane %v313_v55, 1  ;;  %v753_v57 = vrot.slane %v313_v55, 2  ;;  %v902_v58 = vrot.slane %v313_v55, 3  ;;  %v146_v59 = vld [vmem:[%s1319_s2 + $0x8] sm:$0xff]  ;;  %v145_v60 = vld [vmem:[%s1319_s2] sm:$0xff] }
  0x24   :  { %v1085_v1 = vld [vmem:[#allocation2 + $0x180] ss:$8 sps:$4 sm:$0xff]   ;;  %v1096_v6 = vld [vmem:[#allocation2 + $0x114] ss:$8 sps:$4 sm:$0xff]   ;;  %v1091_v9 = vld [vmem:[#allocation2 + $0x190] ss:$8 sps:$4 sm:$0xff]  }
  0x25   :  { %418 = vmatpush1.bf16.msra.mxu0 %v1058_v21  ;;  %1024 = vpush %v604_v56  ;;  %v1088_v3 = vld [vmem:[#allocation2 + $0x100] ss:$8 sps:$4 sm:$0xff]   ;;  %v1094_v10 = vld [vmem:[#allocation2 + $0x110] ss:$8 sps:$4 sm:$0xff]   ;;  %v1099_v11 = vld [vmem:[#allocation2 + $0x1a4] ss:$8 sps:$4 sm:$0xff]  }
  0x26   :  { %419 = vmatprep.subr.bf16.mxu0 %v1066_v22  ;;  %1026 = vpush %v753_v57  ;;  %v1102_v12 = vld [vmem:[#allocation2 + $0x124] ss:$8 sps:$4 sm:$0xff]   ;;  %v1097_v13 = vld [vmem:[#allocation2 + $0x1a0] ss:$8 sps:$4 sm:$0xff]   ;;  %v1105_v15 = vld [vmem:[#allocation2 + $0x1b4] ss:$8 sps:$4 sm:$0xff]  }
  0x27   :  { %v1134_v23 = vpop.eup %1133  ;;  %1028 = vpush %v902_v58  ;;  %v1100_v14 = vld [vmem:[#allocation2 + $0x120] ss:$8 sps:$4 sm:$0xff]   ;;  %v1108_v16 = vld [vmem:[#allocation2 + $0x134] ss:$8 sps:$4 sm:$0xff]   ;;  %v1103_v17 = vld [vmem:[#allocation2 + $0x1b0] ss:$8 sps:$4 sm:$0xff]  }
  0x28   :  { %v1136_v24 = vpop.eup %1135  ;;  %v1106_v18 = vld [vmem:[#allocation2 + $0x130] ss:$8 sps:$4 sm:$0xff]   ;;  %v1111_v19 = vld [vmem:[#allocation2 + $0x1c4] ss:$8 sps:$4 sm:$0xff]   ;;  %v1109_v21 = vld [vmem:[#allocation2 + $0x1c0] ss:$8 sps:$4 sm:$0xff]  }
  0x29   :  { %v162_v26 = vadd.f32 %v1136_v24, %v1134_v23  ;;  %420 = vmatpush1.bf16.msra.mxu0 %v1064_v25  ;;  %v1114_v20 = vld [vmem:[#allocation2 + $0x144] ss:$8 sps:$4 sm:$0xff]   ;;  %v1112_v22 = vld [vmem:[#allocation2 + $0x140] ss:$8 sps:$4 sm:$0xff]   ;;  %v1115_v25 = vld [vmem:[#allocation2 + $0x1d0] ss:$8 sps:$4 sm:$0xff]  }
  0x2a   :  { %421 = vmatprep.subr.bf16.mxu0 %v1072_v27  ;;  %v1123_v27 = vld [vmem:[#allocation2 + $0x1e4] ss:$8 sps:$4 sm:$0xff]  }
  0x2b   :  { %1137 = vrcp.f32 %v162_v26  ;;  %v1118_v26 = vld [vmem:[#allocation2 + $0x150] ss:$8 sps:$4 sm:$0xff]  }
  0x2d   :  { %422 = vmatpush1.bf16.msra.mxu0 %v1070_v28  ;;  %v1126_v28 = vld [vmem:[#allocation2 + $0x164] ss:$8 sps:$4 sm:$0xff]  }
  0x2e   :  { %423 = vmatprep.subr.bf16.mxu0 %v1078_v29  ;;  %v1121_v29 = vld [vmem:[#allocation2 + $0x1e0] ss:$8 sps:$4 sm:$0xff]  }
  0x31   :  { %424 = vmatpush1.bf16.msra.mxu0 %v1076_v30  ;;  %v148_v30 = vld [vmem:[%s1319_s2 + $0x18] sm:$0xff] }
  0x32   :  { %425 = vmatprep.subr.bf16.mxu0 %v1084_v50 }
  0x35   :  { %v1138_v31 = vpop.eup %1137  ;;  %426 = vmatpush1.bf16.msra.mxu0 %v1082_v51 }
  0x36   :  { %v164_v32 = vmul.f32 %v1138_v31, %v1134_v23  ;;  %v239_v34 = vmul.f32 %v1138_v31, %v1136_v24  ;;  %709 = vmatprep.subr.bf16.mxu0 %v1090_v53  ;;  %v1117_v23 = vld [vmem:[#allocation2 + $0x1d4] ss:$8 sps:$4 sm:$0xff]   ;;  %v1124_v31 = vld [vmem:[#allocation2 + $0x160] ss:$8 sps:$4 sm:$0xff]  }
  0x37   :  { %v1120_v24 = vld [vmem:[#allocation2 + $0x154] ss:$8 sps:$4 sm:$0xff]  }
  0x38   :  { %1015 = vmatmul.mubr.msk.f32.vlgmr.msra.gmra.mrb[0].mxu1 %vm47_vm1, %v164_v32  ;;  %v147_v32 = vld [vmem:[%s1319_s2 + $0x10] sm:$0xff] }
  0x39   :  { %1018 = vmatpush3.msra.mxu1 %v165_v5  ;;  %1019 = vmatprep.mubr.msk.f32.mxu1 %vm1199_vm0, %v1198_v0 }
  0x3a   :  { %560 = vmatprep.subr.bf16.mxu1 %v1039_v33  ;;  %v1129_v33 = vld [vmem:[#allocation2 + $0x1f4] ss:$8 sps:$4 sm:$0xff]  }
  0x3c   :  { %1020 = vmatmul.mubr.msk.f32.vlgmr.msra.gmra.mrb[2].mxu1 %vm47_vm1, %v239_v34  ;;  %v1132_v34 = vld [vmem:[#allocation2 + $0x174] ss:$8 sps:$4 sm:$0xff]  }
  0x3d   :  { %561 = vmatpush1.bf16.msra.mxu1 %v1037_v35  ;;  %592 = vmatprep.mubr.bf16.mxu1 %v1200_v54 }
  0x3e   :  { %562 = vmatprep.subr.bf16.mxu1 %v1045_v36 }
  0x41   :  { %563 = vmatpush1.bf16.msra.mxu1 %v1043_v37  ;;  %v1127_v37 = vld [vmem:[#allocation2 + $0x1f0] ss:$8 sps:$4 sm:$0xff]  }
  0x42   :  { %564 = vmatprep.subr.bf16.mxu1 %v1051_v38  ;;  %v1130_v38 = vld [vmem:[#allocation2 + $0x170] ss:$8 sps:$4 sm:$0xff]  }
  0x45   :  { %565 = vmatpush1.bf16.msra.mxu1 %v1049_v39 }
  0x46   :  { %566 = vmatprep.subr.bf16.mxu1 %v1057_v40 }
  0x49   :  { %567 = vmatpush1.bf16.msra.mxu1 %v1055_v41 }
  0x4a   :  { %568 = vmatprep.subr.bf16.mxu1 %v1063_v42 }
  0x4d   :  { %569 = vmatpush1.bf16.msra.mxu1 %v1061_v43 }
  0x4e   :  { %570 = vmatprep.subr.bf16.mxu1 %v1069_v44 }
  0x51   :  { %571 = vmatpush1.bf16.msra.mxu1 %v1067_v45 }
  0x52   :  { %572 = vmatprep.subr.bf16.mxu1 %v1075_v46 }
  0x54   :  { %s1023_s2 = spop %1022 }
  0x55   :  { %573 = vmatpush1.bf16.msra.mxu1 %v1073_v47 }
  0x56   :  { %574 = vmatprep.subr.bf16.mxu1 %v1081_v48  ;;  %s1025_s12 = spop %1024 }
  0x57   :  { %v606_v56 = vstv %s1025_s12  ;;  %s1027_s13 = spop %1026 }
  0x58   :  { %s1029_s14 = spop %1028 }
  0x59   :  { %575 = vmatpush1.bf16.msra.mxu1 %v1079_v49 }
  0x5a   :  { %858 = vmatprep.subr.bf16.mxu1 %v1087_v52 }
  0xea   :  { %v1008_v61 = vpop.f32.mrb[0].mxu0 }
  0xeb   :  { %v150_v62 = vmul.f32 %v1008_v61, %v146_v59  ;;  %v126_v63 = vpop.f32.mrb[1].mxu0  ;;  %v457_v59 = vstv %s1023_s2 }
  0xec   :  { %v149_v0 = vmul.f32 %v145_v60, %v126_v63 }
  0xed   :  { %v462_v2 = vpack.c.bf16 %v150_v62, %v150_v62 }
  0xee   :  { %v314_v5 = vpack.c.bf16 %v149_v0, %v149_v0  ;;  %v1011_v7 = vpop.f32.mrb[2].mxu0 }
  0xef   :  { %593 = vmatmul.mubr.bf16.vlgmr.msra.gmra.mrb[4].mxu1 %v462_v2  ;;  %v136_v8 = vpop.f32.mrb[3].mxu0  ;;  %v152_v35 = vmul.f32 %v1011_v7, %v148_v30 }
  0xf0   :  { %859 = vmatpush1.bf16.msra.mxu1 %v1085_v1  ;;  %444 = vmatmul.mubr.bf16.vlgmr.msra.gmra.mrb[4].mxu0 %v314_v5  ;;  %v151_v36 = vmul.f32 %v147_v32, %v136_v8 }
  0xf1   :  { %710 = vmatpush1.bf16.msra.mxu0 %v1088_v3  ;;  %860 = vmatprep.subr.bf16.mxu1 %v1093_v4  ;;  %v760_v39 = vpack.c.bf16 %v152_v35, %v152_v35 }
  0xf2   :  { %711 = vmatprep.subr.bf16.mxu0 %v1096_v6  ;;  %890 = vmatprep.mubr.bf16.mxu1 %v1200_v54  ;;  %v611_v41 = vpack.c.bf16 %v151_v36, %v151_v36 }
  0xf3   :  { %741 = vmatprep.mubr.bf16.mxu0 %v1200_v54 }
  0xf4   :  { %861 = vmatpush1.bf16.msra.mxu1 %v1091_v9 }
  0xf5   :  { %712 = vmatpush1.bf16.msra.mxu0 %v1094_v10  ;;  %862 = vmatprep.subr.bf16.mxu1 %v1099_v11 }
  0xf6   :  { %713 = vmatprep.subr.bf16.mxu0 %v1102_v12 }
  0xf8   :  { %863 = vmatpush1.bf16.msra.mxu1 %v1097_v13 }
  0xf9   :  { %714 = vmatpush1.bf16.msra.mxu0 %v1100_v14  ;;  %864 = vmatprep.subr.bf16.mxu1 %v1105_v15  ;;  %v755_v15 = vstv %s1027_s13 }
  0xfa   :  { %715 = vmatprep.subr.bf16.mxu0 %v1108_v16  ;;  %v904_v16 = vstv %s1029_s14 }
  0xfc   :  { %865 = vmatpush1.bf16.msra.mxu1 %v1103_v17 }
  0xfd   :  { %716 = vmatpush1.bf16.msra.mxu0 %v1106_v18  ;;  %866 = vmatprep.subr.bf16.mxu1 %v1111_v19 }
  0xfe   :  { %717 = vmatprep.subr.bf16.mxu0 %v1114_v20 }
 0x100   :  { %867 = vmatpush1.bf16.msra.mxu1 %v1109_v21 }
 0x101   :  { %718 = vmatpush1.bf16.msra.mxu0 %v1112_v22  ;;  %868 = vmatprep.subr.bf16.mxu1 %v1117_v23 }
 0x102   :  { %719 = vmatprep.subr.bf16.mxu0 %v1120_v24 }
 0x104   :  { %869 = vmatpush1.bf16.msra.mxu1 %v1115_v25 }
 0x105   :  { %720 = vmatpush1.bf16.msra.mxu0 %v1118_v26  ;;  %870 = vmatprep.subr.bf16.mxu1 %v1123_v27 }
 0x106   :  { %721 = vmatprep.subr.bf16.mxu0 %v1126_v28 }
 0x108   :  { %871 = vmatpush1.bf16.msra.mxu1 %v1121_v29 }
 0x109   :  { %722 = vmatpush1.bf16.msra.mxu0 %v1124_v31  ;;  %872 = vmatprep.subr.bf16.mxu1 %v1129_v33 }
 0x10a   :  { %723 = vmatprep.subr.bf16.mxu0 %v1132_v34 }
 0x10b   :  { %v235_v40 = vpop.f32.mrb[0].mxu1 }
 0x10c   :  { %873 = vmatpush1.bf16.msra.mxu1 %v1127_v37  ;;  %v1016_v42 = vpop.f32.mrb[1].mxu1 }
 0x10d   :  { %724 = vmatpush1.bf16.msra.mxu0 %v1130_v38 }
 0x10f   :  { %891 = vmatmul.mubr.bf16.vlgmr.msra.gmra.mrb[8].mxu1 %v760_v39  ;;  %v309_v43 = vpop.f32.mrb[2].mxu1 }
 0x110   :  { %742 = vmatmul.mubr.bf16.vlgmr.msra.gmra.mrb[8].mxu0 %v611_v41  ;;  %v1021_v44 = vpop.f32.mrb[3].mxu1 }
 0x1c2   :  { %v594_v45 = vpop.f32.mrb[4].mxu1 }
 0x1c3   :  { %v601_v46 = vmul.f32 %v594_v45, %v235_v40  ;;  %v445_v47 = vpop.f32.mrb[4].mxu0  ;;  %v596_v48 = vpop.f32.mrb[5].mxu1 }
 0x1c4   :  { %v452_v49 = vmul.f32 %v445_v47, %v235_v40  ;;  %v602_v50 = vmul.f32 %v596_v48, %v309_v43  ;;  %v447_v51 = vpop.f32.mrb[5].mxu0  ;;  %v598_v52 = vpop.f32.mrb[6].mxu1 }
 0x1c5   :  { %v453_v53 = vmul.f32 %v447_v51, %v309_v43  ;;  %v449_v54 = vpop.f32.mrb[6].mxu0  ;;  %v599_v55 = vpop.f32.mrb[7].mxu1 }
 0x1c6   :  { %v603_v57 = vadd.f32 %v602_v50, %v601_v46  ;;  %v450_v58 = vpop.f32.mrb[7].mxu0 }
 0x1c7   :  { %v454_v60 = vadd.f32 %v453_v53, %v452_v49 }
 0x1c8   :  { %v608_v61 = vmul.f32 %v606_v56, %v603_v57 }
 0x1c9   :  { %v459_v62 = vmul.f32 %v457_v59, %v454_v60 }
 0x1ca   :  { %1139 = vtanh.f32 %v608_v61 }
 0x1cb   :  { %1141 = vtanh.f32 %v459_v62 }
 0x1d4   :  { %v1140_v63 = vpop.eup %1139 }
 0x1d5   :  { %v1142_v0 = vpop.eup %1141 }
 0x1d6   :  { %v610_v1 = vadd.f32 %v1142_v0, %v1140_v63 }
 0x1e2   :  { %v892_v2 = vpop.f32.mrb[8].mxu1 }
 0x1e3   :  { %v899_v3 = vmul.f32 %v892_v2, %v235_v40  ;;  %v743_v4 = vpop.f32.mrb[8].mxu0  ;;  %v894_v5 = vpop.f32.mrb[9].mxu1 }
 0x1e4   :  { %v750_v6 = vmul.f32 %v743_v4, %v235_v40  ;;  %v900_v7 = vmul.f32 %v894_v5, %v309_v43  ;;  %v745_v8 = vpop.f32.mrb[9].mxu0  ;;  %v896_v9 = vpop.f32.mrb[10].mxu1 }
 0x1e5   :  { %v751_v10 = vmul.f32 %v745_v8, %v309_v43  ;;  %v747_v11 = vpop.f32.mrb[10].mxu0  ;;  %v897_v12 = vpop.f32.mrb[11].mxu1 }
 0x1e6   :  { %v901_v13 = vadd.f32 %v900_v7, %v899_v3  ;;  %v748_v14 = vpop.f32.mrb[11].mxu0 }
 0x1e7   :  { %v752_v17 = vadd.f32 %v751_v10, %v750_v6 }
 0x1e8   :  { %v906_v19 = vmul.f32 %v904_v16, %v901_v13 }
 0x1e9   :  { %v757_v18 = vmul.f32 %v755_v15, %v752_v17 }
 0x1eb   :  { %1143 = vtanh.f32 %v757_v18 }
 0x1ec   :  { %1145 = vtanh.f32 %v906_v19 }
 0x1f5   :  { %v1144_v20 = vpop.eup %1143 }
 0x1f6   :  { %v759_v21 = vadd.f32 %v1144_v20, %v610_v1  ;;  %v1146_v22 = vpop.eup %1145 }
 0x1f8   :  { %v908_v23 = vadd.f32 %v1146_v22, %v759_v21 }
 0x1fa   :  { %909 = vst [vmem:[#allocation5] sm:$0xff] %v908_v23 }
 0x1fb   :  { %1180 = shalt.err (!%p1177_p12)
}
 0x1fc   :  { %s1181_s5 = scalar_lea.hbm %s1324_s7, 128 }
 0x1fd   :  { %p1182_p13 = scmp.ne.s32.totalorder %s1324_s7, %s1181_s5  ;;  %p1185_p0 = scmp.lt.u32.totalorder %s1181_s5, %s1324_s7 }
 0x1ff   :  { %p1187_p1 = pnand %p1185_p0, %p1182_p13 }
 0x201   :  { %1190 = shalt.err (!%p1187_p1)
}
 0x202   :  { %919 = dma.vmem_to_hbm [thread:$0]  %s917_s16, 128, %s1324_s7, [#allocation4]  }
 0x203   :  { %1193 = dma.done.wait [#allocation4], 128  }
 0x204   :  { %1194 = vsyncadd [#allocation4], 4294967168 }
 0x205   :  { %923 = vsyncpa [#allocation3], 1 }
 0x206   :  { %924 = vsyncpa [#allocation4], 1 }

// kernel: tpu_custom_call.1
= control target key start
LH: loop header
LB: loop body
LE: loop exit
PB: predicated region body
PF: predicated region fallthrough
CT: control target
= control target key end

     0   :  { %12 = vsyncpa [#allocation3], 0  ;;  %s1317_s0 = inlined_call_operand.vmem [shape: f32[1,32,8], index: 0, kind: input, shape index: {}]   ;;  %s1318_s1 = inlined_call_operand.vmem [shape: f32[1,16,8], index: 1, kind: input, shape index: {}]   ;;  %s1319_s2 = inlined_call_operand.vmem [shape: f32[1,32,128], index: 2, kind: input, shape index: {}]   ;;  %s1320_s3 = inlined_call_operand.vmem [shape: f32[8,128], index: 3, kind: input, shape index: {}]   ;;  %s1321_s4 = inlined_call_operand.vmem [shape: f32[8,128], index: 4, kind: input, shape index: {}]   ;;  %s1322_s5 = inlined_call_operand.hbm [shape: bf16[4,128,256], index: 5, kind: input, shape index: {}]   ;;  %s1323_s6 = inlined_call_operand.vmem [shape: f32[4,1], index: 6, kind: input, shape index: {}]   ;;  %s1324_s7 = inlined_call_operand.hbm [shape: f32[8,128], index: 7, kind: output, shape index: {}]  }
   0x1   :  { %13 = vsyncpa [#allocation4], 0  ;;  %s1195_s24 = smov [#allocation2]   ;;  %s1147_s28 = scalar_lea.hbm %s1322_s5, 8192 }
   0x2   :  { %s29_s25 = sshll.u32 %s1195_s24, 4  ;;  %p1148_p0 = scmp.ne.s32.totalorder %s1322_s5, %s1147_s28  ;;  %s30_s25 = int_to_ptr.vmem [resolvable:$true] %s29_s25 }
   0x3   :  { %p1151_p1 = scmp.lt.u32.totalorder %s1147_s28, %s1322_s5 }
   0x5   :  { %p1153_p2 = pnand %p1151_p1, %p1148_p0 }
   0x7   :  { %1156 = shalt.err (!%p1153_p2)
}
   0x8   :  { %s1157_s10 = scalar_lea.vmem %s30_s25, 8192  ;;  %p1162_p4 = scmp.lt.s32.totalorder %s30_s25, %s30_s25 }
   0x9   :  { %p1158_p3 = scmp.ne.s32.totalorder %s30_s25, %s1157_s10  ;;  %p1163_p5 = scmp.lt.s32.totalorder %s1157_s10, %s1157_s10 }
   0xb   :  { %p1164_p6 = por %p1163_p5, %p1162_p4 }
   0xd   :  { %p1165_p7 = pnand %p1164_p6, %p1158_p3 }
   0xf   :  { %1168 = shalt.err (!%p1165_p7)
}
  0x10   :  { %s1196_s11 = smov 128   ;;  %s1197_s12 = smov 8  }
  0x11   :  { %35 = dma.hbm_to_vmem [thread:$0]  %s1322_s5, 8192, %s30_s25, [#allocation3], %s1196_s11, %s1196_s11, %s1197_s12  }
  0x12   :  { %1191 = dma.done.wait [#allocation3], 8192  }
  0x13   :  { %1192 = vsyncadd [#allocation3], 4294959104  ;;  %v1198_v0 = vmov 0.0   ;;  %vm1199_vm0 = vmmov 0   ;;  %vm47_vm1 = vcmask 64512   ;;  %v46_v1 = vld [vmem:[%s1320_s3] sm:$0xff] }
  0x14   :  { %1012 = vmatprep.subr.mxu1 %v1198_v0  ;;  %1014 = vmatprep.mubr.msk.f32.mxu1 %vm1199_vm0, %v1198_v0  ;;  %v42_v2 = vld [vmem:[%s1317_s0] sm:$0xff]  ;;  %v43_v3 = vld [vmem:[%s1317_s0 + $0x8] sm:$0xff]  ;;  %v44_v4 = vld [vmem:[%s1317_s0 + $0x10] sm:$0xff]  ;;  %v1200_v54 = vmov 0   ;;  %s1201_s15 = smov [#allocation5]  }
  0x15   :  { %1004 = vmatprep.subr.mxu0 %v46_v1  ;;  %1006 = vmatprep.mubr.msk.f32.mxu0 %vm47_vm1, %v42_v2  ;;  %v165_v5 = vld [vmem:[%s1321_s4] sm:$0xff]  ;;  %v154_v7 = vld [vmem:[%s1318_s1 + $0x8] sm:$0xff]  ;;  %v45_v8 = vld [vmem:[%s1317_s0 + $0x18] sm:$0xff]  ;;  %s916_s16 = sshll.u32 %s1201_s15, 4  ;;  %s917_s16 = int_to_ptr.vmem [resolvable:$true] %s916_s16 }
  0x16   :  { %1005 = vmatpush3.msra.mxu0 %v46_v1  ;;  %1013 = vmatpush3.msra.mxu1 %v165_v5  ;;  %v153_v6 = vld [vmem:[%s1318_s1] sm:$0xff]  ;;  %v1046_v16 = vld [vmem:[#allocation2 + $0x10] ss:$8 sps:$4 sm:$0xff]   ;;  %v1048_v17 = vld [vmem:[#allocation2 + $0x14] ss:$8 sps:$4 sm:$0xff]   ;;  %s1169_s17 = scalar_lea.vmem %s917_s16, 128  ;;  %p1174_p9 = scmp.lt.s32.totalorder %s917_s16, %s917_s16 }
  0x17   :  { %1007 = vmatmul.mubr.msk.f32.vlgmr.msra.gmra.mrb[0].mxu0 %vm47_vm1, %v43_v3  ;;  %v155_v9 = vmax.f32 %v153_v6, %v154_v7  ;;  %1017 = vmatprep.subr.mxu1 %v1198_v0  ;;  %v1040_v10 = vld [vmem:[#allocation2] ss:$8 sps:$4 sm:$0xff]   ;;  %v1042_v13 = vld [vmem:[#allocation2 + $0x4] ss:$8 sps:$4 sm:$0xff]   ;;  %v1060_v20 = vld [vmem:[#allocation2 + $0x34] ss:$8 sps:$4 sm:$0xff]   ;;  %p1170_p8 = scmp.ne.s32.totalorder %s917_s16, %s1169_s17  ;;  %p1175_p10 = scmp.lt.s32.totalorder %s1169_s17, %s1169_s17 }
  0x18   :  { %1009 = vmatprep.mubr.msk.f32.mxu0 %vm47_vm1, %v44_v4  ;;  %411 = vmatprep.subr.bf16.mxu0 %v1042_v13  ;;  %v1054_v18 = vld [vmem:[#allocation2 + $0x24] ss:$8 sps:$4 sm:$0xff]   ;;  %v1052_v19 = vld [vmem:[#allocation2 + $0x20] ss:$8 sps:$4 sm:$0xff]   ;;  %v1058_v21 = vld [vmem:[#allocation2 + $0x30] ss:$8 sps:$4 sm:$0xff]  }
  0x19   :  { %v156_v11 = vsub.f32 %v153_v6, %v155_v9  ;;  %v159_v12 = vsub.f32 %v154_v7, %v155_v9  ;;  %412 = vmatpush1.bf16.msra.mxu0 %v1040_v10  ;;  %v1066_v22 = vld [vmem:[#allocation2 + $0x44] ss:$8 sps:$4 sm:$0xff]   ;;  %v1064_v25 = vld [vmem:[#allocation2 + $0x40] ss:$8 sps:$4 sm:$0xff]   ;;  %v1072_v27 = vld [vmem:[#allocation2 + $0x54] ss:$8 sps:$4 sm:$0xff]   ;;  %p1176_p11 = por %p1175_p10, %p1174_p9 }
  0x1a   :  { %413 = vmatprep.subr.bf16.mxu0 %v1048_v17  ;;  %v1070_v28 = vld [vmem:[#allocation2 + $0x50] ss:$8 sps:$4 sm:$0xff]   ;;  %v1078_v29 = vld [vmem:[#allocation2 + $0x64] ss:$8 sps:$4 sm:$0xff]   ;;  %v1076_v30 = vld [vmem:[#allocation2 + $0x60] ss:$8 sps:$4 sm:$0xff]  }
  0x1b   :  { %1010 = vmatmul.mubr.msk.f32.gmra.mrb[2].mxu0 %vm47_vm1, %v45_v8  ;;  %v157_v14 = vmul.f32 1.442695, %v156_v11  ;;  %v160_v15 = vmul.f32 1.442695, %v159_v12  ;;  %v1039_v33 = vld [vmem:[#allocation2 + $0x84] ss:$8 sps:$4 sm:$0xff]   ;;  %p1177_p12 = pnand %p1176_p11, %p1170_p8 }
  0x1c   :  { %v1037_v35 = vld [vmem:[#allocation2 + $0x80] ss:$8 sps:$4 sm:$0xff]   ;;  %v1045_v36 = vld [vmem:[#allocation2 + $0x94] ss:$8 sps:$4 sm:$0xff]   ;;  %v1043_v37 = vld [vmem:[#allocation2 + $0x90] ss:$8 sps:$4 sm:$0xff]   ;;  %443 = vmatprep.mubr.bf16.mxu0 %v1200_v54 }
  0x1d   :  { %1133 = vpow2.f32 %v157_v14  ;;  %414 = vmatpush1.bf16.msra.mxu0 %v1046_v16  ;;  %v1051_v38 = vld [vmem:[#allocation2 + $0xa4] ss:$8 sps:$4 sm:$0xff]   ;;  %v1049_v39 = vld [vmem:[#allocation2 + $0xa0] ss:$8 sps:$4 sm:$0xff]   ;;  %v1057_v40 = vld [vmem:[#allocation2 + $0xb4] ss:$8 sps:$4 sm:$0xff]  }
  0x1e   :  { %1135 = vpow2.f32 %v160_v15  ;;  %415 = vmatprep.subr.bf16.mxu0 %v1054_v18  ;;  %v1055_v41 = vld [vmem:[#allocation2 + $0xb0] ss:$8 sps:$4 sm:$0xff]   ;;  %v1063_v42 = vld [vmem:[#allocation2 + $0xc4] ss:$8 sps:$4 sm:$0xff]   ;;  %v1061_v43 = vld [vmem:[#allocation2 + $0xc0] ss:$8 sps:$4 sm:$0xff]  }
  0x1f   :  { %v1069_v44 = vld [vmem:[#allocation2 + $0xd4] ss:$8 sps:$4 sm:$0xff]   ;;  %v1067_v45 = vld [vmem:[#allocation2 + $0xd0] ss:$8 sps:$4 sm:$0xff]   ;;  %v1075_v46 = vld [vmem:[#allocation2 + $0xe4] ss:$8 sps:$4 sm:$0xff]  }
  0x20   :  { %v1073_v47 = vld [vmem:[#allocation2 + $0xe0] ss:$8 sps:$4 sm:$0xff]   ;;  %v1081_v48 = vld [vmem:[#allocation2 + $0xf4] ss:$8 sps:$4 sm:$0xff]   ;;  %v1079_v49 = vld [vmem:[#allocation2 + $0xf0] ss:$8 sps:$4 sm:$0xff]  }
  0x21   :  { %416 = vmatpush1.bf16.msra.mxu0 %v1052_v19  ;;  %v1084_v50 = vld [vmem:[#allocation2 + $0x74] ss:$8 sps:$4 sm:$0xff]   ;;  %v1082_v51 = vld [vmem:[#allocation2 + $0x70] ss:$8 sps:$4 sm:$0xff]   ;;  %v1087_v52 = vld [vmem:[#allocation2 + $0x184] ss:$8 sps:$4 sm:$0xff]  }
  0x22   :  { %417 = vmatprep.subr.bf16.mxu0 %v1060_v20  ;;  %v1090_v53 = vld [vmem:[#allocation2 + $0x104] ss:$8 sps:$4 sm:$0xff]   ;;  %v313_v55 = vld [vmem:[%s1323_s6] sm:$0xf]  ;;  %v1093_v4 = vld [vmem:[#allocation2 + $0x194] ss:$8 sps:$4 sm:$0xff]  }
  0x23   :  { %1022 = vpush %v313_v55  ;;  %v604_v56 = vrot.slane %v313_v55, 1  ;;  %v753_v57 = vrot.slane %v313_v55, 2  ;;  %v902_v58 = vrot.slane %v313_v55, 3  ;;  %v146_v59 = vld [vmem:[%s1319_s2 + $0x8] sm:$0xff]  ;;  %v145_v60 = vld [vmem:[%s1319_s2] sm:$0xff] }
  0x24   :  { %v1085_v1 = vld [vmem:[#allocation2 + $0x180] ss:$8 sps:$4 sm:$0xff]   ;;  %v1096_v6 = vld [vmem:[#allocation2 + $0x114] ss:$8 sps:$4 sm:$0xff]   ;;  %v1091_v9 = vld [vmem:[#allocation2 + $0x190] ss:$8 sps:$4 sm:$0xff]  }
  0x25   :  { %418 = vmatpush1.bf16.msra.mxu0 %v1058_v21  ;;  %1024 = vpush %v604_v56  ;;  %v1088_v3 = vld [vmem:[#allocation2 + $0x100] ss:$8 sps:$4 sm:$0xff]   ;;  %v1094_v10 = vld [vmem:[#allocation2 + $0x110] ss:$8 sps:$4 sm:$0xff]   ;;  %v1099_v11 = vld [vmem:[#allocation2 + $0x1a4] ss:$8 sps:$4 sm:$0xff]  }
  0x26   :  { %419 = vmatprep.subr.bf16.mxu0 %v1066_v22  ;;  %1026 = vpush %v753_v57  ;;  %v1102_v12 = vld [vmem:[#allocation2 + $0x124] ss:$8 sps:$4 sm:$0xff]   ;;  %v1097_v13 = vld [vmem:[#allocation2 + $0x1a0] ss:$8 sps:$4 sm:$0xff]   ;;  %v1105_v15 = vld [vmem:[#allocation2 + $0x1b4] ss:$8 sps:$4 sm:$0xff]  }
  0x27   :  { %v1134_v23 = vpop.eup %1133  ;;  %1028 = vpush %v902_v58  ;;  %v1100_v14 = vld [vmem:[#allocation2 + $0x120] ss:$8 sps:$4 sm:$0xff]   ;;  %v1108_v16 = vld [vmem:[#allocation2 + $0x134] ss:$8 sps:$4 sm:$0xff]   ;;  %v1103_v17 = vld [vmem:[#allocation2 + $0x1b0] ss:$8 sps:$4 sm:$0xff]  }
  0x28   :  { %v1136_v24 = vpop.eup %1135  ;;  %v1106_v18 = vld [vmem:[#allocation2 + $0x130] ss:$8 sps:$4 sm:$0xff]   ;;  %v1111_v19 = vld [vmem:[#allocation2 + $0x1c4] ss:$8 sps:$4 sm:$0xff]   ;;  %v1109_v21 = vld [vmem:[#allocation2 + $0x1c0] ss:$8 sps:$4 sm:$0xff]  }
  0x29   :  { %v162_v26 = vadd.f32 %v1136_v24, %v1134_v23  ;;  %420 = vmatpush1.bf16.msra.mxu0 %v1064_v25  ;;  %v1114_v20 = vld [vmem:[#allocation2 + $0x144] ss:$8 sps:$4 sm:$0xff]   ;;  %v1112_v22 = vld [vmem:[#allocation2 + $0x140] ss:$8 sps:$4 sm:$0xff]   ;;  %v1115_v25 = vld [vmem:[#allocation2 + $0x1d0] ss:$8 sps:$4 sm:$0xff]  }
  0x2a   :  { %421 = vmatprep.subr.bf16.mxu0 %v1072_v27  ;;  %v1123_v27 = vld [vmem:[#allocation2 + $0x1e4] ss:$8 sps:$4 sm:$0xff]  }
  0x2b   :  { %1137 = vrcp.f32 %v162_v26  ;;  %v1118_v26 = vld [vmem:[#allocation2 + $0x150] ss:$8 sps:$4 sm:$0xff]  }
  0x2d   :  { %422 = vmatpush1.bf16.msra.mxu0 %v1070_v28  ;;  %v1126_v28 = vld [vmem:[#allocation2 + $0x164] ss:$8 sps:$4 sm:$0xff]  }
  0x2e   :  { %423 = vmatprep.subr.bf16.mxu0 %v1078_v29  ;;  %v1121_v29 = vld [vmem:[#allocation2 + $0x1e0] ss:$8 sps:$4 sm:$0xff]  }
  0x31   :  { %424 = vmatpush1.bf16.msra.mxu0 %v1076_v30  ;;  %v148_v30 = vld [vmem:[%s1319_s2 + $0x18] sm:$0xff] }
  0x32   :  { %425 = vmatprep.subr.bf16.mxu0 %v1084_v50 }
  0x35   :  { %v1138_v31 = vpop.eup %1137  ;;  %426 = vmatpush1.bf16.msra.mxu0 %v1082_v51 }
  0x36   :  { %v164_v32 = vmul.f32 %v1138_v31, %v1134_v23  ;;  %v239_v34 = vmul.f32 %v1138_v31, %v1136_v24  ;;  %709 = vmatprep.subr.bf16.mxu0 %v1090_v53  ;;  %v1117_v23 = vld [vmem:[#allocation2 + $0x1d4] ss:$8 sps:$4 sm:$0xff]   ;;  %v1124_v31 = vld [vmem:[#allocation2 + $0x160] ss:$8 sps:$4 sm:$0xff]  }
  0x37   :  { %v1120_v24 = vld [vmem:[#allocation2 + $0x154] ss:$8 sps:$4 sm:$0xff]  }
  0x38   :  { %1015 = vmatmul.mubr.msk.f32.vlgmr.msra.gmra.mrb[0].mxu1 %vm47_vm1, %v164_v32  ;;  %v147_v32 = vld [vmem:[%s1319_s2 + $0x10] sm:$0xff] }
  0x39   :  { %1018 = vmatpush3.msra.mxu1 %v165_v5  ;;  %1019 = vmatprep.mubr.msk.f32.mxu1 %vm1199_vm0, %v1198_v0 }
  0x3a   :  { %560 = vmatprep.subr.bf16.mxu1 %v1039_v33  ;;  %v1129_v33 = vld [vmem:[#allocation2 + $0x1f4] ss:$8 sps:$4 sm:$0xff]  }
  0x3c   :  { %1020 = vmatmul.mubr.msk.f32.vlgmr.msra.gmra.mrb[2].mxu1 %vm47_vm1, %v239_v34  ;;  %v1132_v34 = vld [vmem:[#allocation2 + $0x174] ss:$8 sps:$4 sm:$0xff]  }
  0x3d   :  { %561 = vmatpush1.bf16.msra.mxu1 %v1037_v35  ;;  %592 = vmatprep.mubr.bf16.mxu1 %v1200_v54 }
  0x3e   :  { %562 = vmatprep.subr.bf16.mxu1 %v1045_v36 }
  0x41   :  { %563 = vmatpush1.bf16.msra.mxu1 %v1043_v37  ;;  %v1127_v37 = vld [vmem:[#allocation2 + $0x1f0] ss:$8 sps:$4 sm:$0xff]  }
  0x42   :  { %564 = vmatprep.subr.bf16.mxu1 %v1051_v38  ;;  %v1130_v38 = vld [vmem:[#allocation2 + $0x170] ss:$8 sps:$4 sm:$0xff]  }
  0x45   :  { %565 = vmatpush1.bf16.msra.mxu1 %v1049_v39 }
  0x46   :  { %566 = vmatprep.subr.bf16.mxu1 %v1057_v40 }
  0x49   :  { %567 = vmatpush1.bf16.msra.mxu1 %v1055_v41 }
  0x4a   :  { %568 = vmatprep.subr.bf16.mxu1 %v1063_v42 }
  0x4d   :  { %569 = vmatpush1.bf16.msra.mxu1 %v1061_v43 }
  0x4e   :  { %570 = vmatprep.subr.bf16.mxu1 %v1069_v44 }
  0x51   :  { %571 = vmatpush1.bf16.msra.mxu1 %v1067_v45 }
  0x52   :  { %572 = vmatprep.subr.bf16.mxu1 %v1075_v46 }
  0x54   :  { %s1023_s2 = spop %1022 }
  0x55   :  { %573 = vmatpush1.bf16.msra.mxu1 %v1073_v47 }
  0x56   :  { %574 = vmatprep.subr.bf16.mxu1 %v1081_v48  ;;  %s1025_s12 = spop %1024 }
  0x57   :  { %v606_v56 = vstv %s1025_s12  ;;  %s1027_s13 = spop %1026 }
  0x58   :  { %s1029_s14 = spop %1028 }
  0x59   :  { %575 = vmatpush1.bf16.msra.mxu1 %v1079_v49 }
  0x5a   :  { %858 = vmatprep.subr.bf16.mxu1 %v1087_v52 }
  0xea   :  { %v1008_v61 = vpop.f32.mrb[0].mxu0 }
  0xeb   :  { %v150_v62 = vmul.f32 %v1008_v61, %v146_v59  ;;  %v126_v63 = vpop.f32.mrb[1].mxu0  ;;  %v457_v59 = vstv %s1023_s2 }
  0xec   :  { %v149_v0 = vmul.f32 %v145_v60, %v126_v63 }
  0xed   :  { %v462_v2 = vpack.c.bf16 %v150_v62, %v150_v62 }
  0xee   :  { %v314_v5 = vpack.c.bf16 %v149_v0, %v149_v0  ;;  %v1011_v7 = vpop.f32.mrb[2].mxu0 }
  0xef   :  { %593 = vmatmul.mubr.bf16.vlgmr.msra.gmra.mrb[4].mxu1 %v462_v2  ;;  %v136_v8 = vpop.f32.mrb[3].mxu0  ;;  %v152_v35 = vmul.f32 %v1011_v7, %v148_v30 }
  0xf0   :  { %859 = vmatpush1.bf16.msra.mxu1 %v1085_v1  ;;  %444 = vmatmul.mubr.bf16.vlgmr.msra.gmra.mrb[4].mxu0 %v314_v5  ;;  %v151_v36 = vmul.f32 %v147_v32, %v136_v8 }
  0xf1   :  { %710 = vmatpush1.bf16.msra.mxu0 %v1088_v3  ;;  %860 = vmatprep.subr.bf16.mxu1 %v1093_v4  ;;  %v760_v39 = vpack.c.bf16 %v152_v35, %v152_v35 }
  0xf2   :  { %711 = vmatprep.subr.bf16.mxu0 %v1096_v6  ;;  %890 = vmatprep.mubr.bf16.mxu1 %v1200_v54  ;;  %v611_v41 = vpack.c.bf16 %v151_v36, %v151_v36 }
  0xf3   :  { %741 = vmatprep.mubr.bf16.mxu0 %v1200_v54 }
  0xf4   :  { %861 = vmatpush1.bf16.msra.mxu1 %v1091_v9 }
  0xf5   :  { %712 = vmatpush1.bf16.msra.mxu0 %v1094_v10  ;;  %862 = vmatprep.subr.bf16.mxu1 %v1099_v11 }
  0xf6   :  { %713 = vmatprep.subr.bf16.mxu0 %v1102_v12 }
  0xf8   :  { %863 = vmatpush1.bf16.msra.mxu1 %v1097_v13 }
  0xf9   :  { %714 = vmatpush1.bf16.msra.mxu0 %v1100_v14  ;;  %864 = vmatprep.subr.bf16.mxu1 %v1105_v15  ;;  %v755_v15 = vstv %s1027_s13 }
  0xfa   :  { %715 = vmatprep.subr.bf16.mxu0 %v1108_v16  ;;  %v904_v16 = vstv %s1029_s14 }
  0xfc   :  { %865 = vmatpush1.bf16.msra.mxu1 %v1103_v17 }
  0xfd   :  { %716 = vmatpush1.bf16.msra.mxu0 %v1106_v18  ;;  %866 = vmatprep.subr.bf16.mxu1 %v1111_v19 }
  0xfe   :  { %717 = vmatprep.subr.bf16.mxu0 %v1114_v20 }
 0x100   :  { %867 = vmatpush1.bf16.msra.mxu1 %v1109_v21 }
 0x101   :  { %718 = vmatpush1.bf16.msra.mxu0 %v1112_v22  ;;  %868 = vmatprep.subr.bf16.mxu1 %v1117_v23 }
 0x102   :  { %719 = vmatprep.subr.bf16.mxu0 %v1120_v24 }
 0x104   :  { %869 = vmatpush1.bf16.msra.mxu1 %v1115_v25 }
 0x105   :  { %720 = vmatpush1.bf16.msra.mxu0 %v1118_v26  ;;  %870 = vmatprep.subr.bf16.mxu1 %v1123_v27 }
 0x106   :  { %721 = vmatprep.subr.bf16.mxu0 %v1126_v28 }
 0x108   :  { %871 = vmatpush1.bf16.msra.mxu1 %v1121_v29 }
 0x109   :  { %722 = vmatpush1.bf16.msra.mxu0 %v1124_v31  ;;  %872 = vmatprep.subr.bf16.mxu1 %v1129_v33 }
 0x10a   :  { %723 = vmatprep.subr.bf16.mxu0 %v1132_v34 }
 0x10b   :  { %v235_v40 = vpop.f32.mrb[0].mxu1 }
 0x10c   :  { %873 = vmatpush1.bf16.msra.mxu1 %v1127_v37  ;;  %v1016_v42 = vpop.f32.mrb[1].mxu1 }
 0x10d   :  { %724 = vmatpush1.bf16.msra.mxu0 %v1130_v38 }
 0x10f   :  { %891 = vmatmul.mubr.bf16.vlgmr.msra.gmra.mrb[8].mxu1 %v760_v39  ;;  %v309_v43 = vpop.f32.mrb[2].mxu1 }
 0x110   :  { %742 = vmatmul.mubr.bf16.vlgmr.msra.gmra.mrb[8].mxu0 %v611_v41  ;;  %v1021_v44 = vpop.f32.mrb[3].mxu1 }
 0x1c2   :  { %v594_v45 = vpop.f32.mrb[4].mxu1 }
 0x1c3   :  { %v601_v46 = vmul.f32 %v594_v45, %v235_v40  ;;  %v445_v47 = vpop.f32.mrb[4].mxu0  ;;  %v596_v48 = vpop.f32.mrb[5].mxu1 }
 0x1c4   :  { %v452_v49 = vmul.f32 %v445_v47, %v235_v40  ;;  %v602_v50 = vmul.f32 %v596_v48, %v309_v43  ;;  %v447_v51 = vpop.f32.mrb[5].mxu0  ;;  %v598_v52 = vpop.f32.mrb[6].mxu1 }
 0x1c5   :  { %v453_v53 = vmul.f32 %v447_v51, %v309_v43  ;;  %v449_v54 = vpop.f32.mrb[6].mxu0  ;;  %v599_v55 = vpop.f32.mrb[7].mxu1 }
 0x1c6   :  { %v603_v57 = vadd.f32 %v602_v50, %v601_v46  ;;  %v450_v58 = vpop.f32.mrb[7].mxu0 }
 0x1c7   :  { %v454_v60 = vadd.f32 %v453_v53, %v452_v49 }
 0x1c8   :  { %v608_v61 = vmul.f32 %v606_v56, %v603_v57 }
 0x1c9   :  { %v459_v62 = vmul.f32 %v457_v59, %v454_v60 }
 0x1ca   :  { %1139 = vtanh.f32 %v608_v61 }
 0x1cb   :  { %1141 = vtanh.f32 %v459_v62 }
 0x1d4   :  { %v1140_v63 = vpop.eup %1139 }
 0x1d5   :  { %v1142_v0 = vpop.eup %1141 }
 0x1d6   :  { %v610_v1 = vadd.f32 %v1142_v0, %v1140_v63 }
 0x1e2   :  { %v892_v2 = vpop.f32.mrb[8].mxu1 }
 0x1e3   :  { %v899_v3 = vmul.f32 %v892_v2, %v235_v40  ;;  %v743_v4 = vpop.f32.mrb[8].mxu0  ;;  %v894_v5 = vpop.f32.mrb[9].mxu1 }
 0x1e4   :  { %v750_v6 = vmul.f32 %v743_v4, %v235_v40  ;;  %v900_v7 = vmul.f32 %v894_v5, %v309_v43  ;;  %v745_v8 = vpop.f32.mrb[9].mxu0  ;;  %v896_v9 = vpop.f32.mrb[10].mxu1 }
 0x1e5   :  { %v751_v10 = vmul.f32 %v745_v8, %v309_v43  ;;  %v747_v11 = vpop.f32.mrb[10].mxu0  ;;  %v897_v12 = vpop.f32.mrb[11].mxu1 }
 0x1e6   :  { %v901_v13 = vadd.f32 %v900_v7, %v899_v3  ;;  %v748_v14 = vpop.f32.mrb[11].mxu0 }
 0x1e7   :  { %v752_v17 = vadd.f32 %v751_v10, %v750_v6 }
 0x1e8   :  { %v906_v19 = vmul.f32 %v904_v16, %v901_v13 }
 0x1e9   :  { %v757_v18 = vmul.f32 %v755_v15, %v752_v17 }
 0x1eb   :  { %1143 = vtanh.f32 %v757_v18 }
 0x1ec   :  { %1145 = vtanh.f32 %v906_v19 }
 0x1f5   :  { %v1144_v20 = vpop.eup %1143 }
 0x1f6   :  { %v759_v21 = vadd.f32 %v1144_v20, %v610_v1  ;;  %v1146_v22 = vpop.eup %1145 }
 0x1f8   :  { %v908_v23 = vadd.f32 %v1146_v22, %v759_v21 }
 0x1fa   :  { %909 = vst [vmem:[#allocation5] sm:$0xff] %v908_v23 }
 0x1fb   :  { %1180 = shalt.err (!%p1177_p12)
}
 0x1fc   :  { %s1181_s5 = scalar_lea.hbm %s1324_s7, 128 }
 0x1fd   :  { %p1182_p13 = scmp.ne.s32.totalorder %s1324_s7, %s1181_s5  ;;  %p1185_p0 = scmp.lt.u32.totalorder %s1181_s5, %s1324_s7 }
 0x1ff   :  { %p1187_p1 = pnand %p1185_p0, %p1182_p13 }
 0x201   :  { %1190 = shalt.err (!%p1187_p1)
}
 0x202   :  { %919 = dma.vmem_to_hbm [thread:$0]  %s917_s16, 128, %s1324_s7, [#allocation4]  }
 0x203   :  { %1193 = dma.done.wait [#allocation4], 128  }
 0x204   :  { %1194 = vsyncadd [#allocation4], 4294967168 }
 0x205   :  { %923 = vsyncpa [#allocation3], 1 }
 0x206   :  { %924 = vsyncpa [#allocation4], 1 }

</bundles_post_ra>
